<compile_context>
chip_gen: v7x
topology: tpu7x:2x2x1
jax: 0.10.0
libtpu: 0.0.40
codegen_flags: <defaults>
</compile_context>

<pallas_src>
import functools
import math

import jax
import jax.numpy as jnp
from jax.experimental import pallas as pl
from jax.experimental.pallas import tpu as pltpu


_HAS_BUFFERED = hasattr(pl, "Buffered")


def _round_up(x, m):
    return (x + m - 1) // m * m


def _layer_norm(x, gamma, beta, eps=1e-5):
    mean = jnp.mean(x, axis=-1, keepdims=True)
    var = jnp.mean((x - mean) ** 2, axis=-1, keepdims=True)
    return (x - mean) * jax.lax.rsqrt(var + eps) * gamma + beta


def decoder_layer_kernel(hc_ref, wq_ref, wk_ref, wv_ref, wo_ref,
                         ln1_g_ref, ln1_b_ref, w1_ref, b1_ref,
                         w2_ref, b2_ref, ln2_g_ref, ln2_b_ref,
                         out_ref, k_scr, v_scr,
                         *, n_head, d_head, q_tile, scale):
    f32 = jnp.float32
    cdt = wq_ref.dtype                       # MXU operand dtype (f32 here; bf16 on TPU ok)
    hd = n_head * d_head
    S = hc_ref.shape[0]
    qi = pl.program_id(1)                    # inner ("arbitrary") query-tile axis

    # ---- K/V projection: once per batch (context block is grid-invariant over qi) ----
    @pl.when(qi == 0)
    def _():
        hc = hc_ref[...].astype(cdt)                                       # (S, D)
        k = jnp.dot(hc, wk_ref[...], preferred_element_type=f32)           # (S, hd)
        v = jnp.dot(hc, wv_ref[...], preferred_element_type=f32)           # (S, hd)
        # (S, hd) -> (S, H, Dh) -> (H, S, Dh): head-leading permute, no lane transpose.
        k_scr[...] = jnp.transpose(k.reshape(S, n_head, d_head), (1, 0, 2)).astype(cdt)
        v_scr[...] = jnp.transpose(v.reshape(S, n_head, d_head), (1, 0, 2)).astype(cdt)

    # ---- query rows: slice from the resident context block (no second DMA) ----
    q0 = pl.multiple_of(qi * q_tile, q_tile)
    hq32 = hc_ref[pl.ds(q0, q_tile), :].astype(f32)                        # (tq, D)

    q = jnp.dot(hq32.astype(cdt), wq_ref[...], preferred_element_type=f32) * scale
    q_hqd = jnp.transpose(q.reshape(q_tile, n_head, d_head), (1, 0, 2)).astype(cdt)

    # scores: only the small (S, Dh) K operand is MXU-transposed (flash-standard form)
    s = jnp.einsum("hqd,hkd->hqk", q_hqd, k_scr[...],
                   preferred_element_type=f32)                             # (H, tq, S)
    s = s - jnp.max(s, axis=-1, keepdims=True)
    e = jnp.exp(s)
    denom = jnp.sum(e, axis=-1, keepdims=True)                             # (H, tq, 1)
    pv = jnp.einsum("hqk,hkd->hqd", e.astype(cdt), v_scr[...],
                    preferred_element_type=f32)                            # (H, tq, Dh)
    # deferred softmax normalization: scale the (H, tq, Dh) result, not (H, tq, S) probs
    pv = pv * pl.reciprocal(denom, approx=True)

    attn_vec = jnp.transpose(pv, (1, 0, 2)).reshape(q_tile, hd)            # (tq, hd)
    attn_out = jnp.dot(attn_vec.astype(cdt), wo_ref[...],
                       preferred_element_type=f32)                         # (tq, D)

    # post-lnorm residual 1
    x = _layer_norm(hq32 + attn_out, ln1_g_ref[...], ln1_b_ref[...])

    # ---- PositionwiseFF ----
    ff1 = jnp.maximum(
        jnp.dot(x.astype(cdt), w1_ref[...], preferred_element_type=f32) + b1_ref[...],
        0.0)                                                               # (tq, d_inner)
    ff2 = jnp.dot(ff1.astype(cdt), w2_ref[...],
                  preferred_element_type=f32) + b2_ref[...]                # (tq, D)

    out = _layer_norm(x + ff2, ln2_g_ref[...], ln2_b_ref[...])
    out_ref[...] = out.astype(out_ref.dtype)


def _pick_q_tile(S, q_block, per_row_bytes, budget_bytes):
    """Largest multiple-of-8 divisor of S whose working set fits the VMEM budget."""
    if q_block is not None and q_block % 8 == 0 and S % q_block == 0:
        return q_block
    cand = [t for t in range(8, S + 1, 8) if S % t == 0] or [S]
    fitting = [t for t in cand if t * per_row_bytes <= budget_bytes]
    if fitting:
        aligned = [t for t in fitting if t % 128 == 0]      # MXU-friendly M dimension
        return max(aligned) if aligned else max(fitting)
    # TODO(synk): if even the smallest tile does not fit (very long S on v7x), a
    # flash-style online-softmax key-tiling pass is needed; we let the compiler try.
    return min(cand)


def decoder_layer_bsd(h_bsd, params, *, n_head, d_head, q_block=None,
                      single_buffer_weights=None):
    """Batch-major entry point: h_bsd is (B, S, D), returns (B, S, D)."""
    B, S, D = h_bsd.shape
    hd = n_head * d_head
    d_inner = params["w1"].shape[0]
    f32 = jnp.float32
    itemsize = h_bsd.dtype.itemsize

    if single_buffer_weights is None:
        single_buffer_weights = _HAS_BUFFERED

    # Host-side one-time weight prep: transposes + K/V split hoisted out of the kernel.
    wkv = params["wkv"]
    weights = (
        params["wq"].T,                                    # (D, hd)
        wkv[:hd].T,                                        # wk: (D, hd)
        wkv[hd:].T,                                        # wv: (D, hd)
        params["wo"].T,                                    # (hd, D)
        params["ln1_g"].astype(f32), params["ln1_b"].astype(f32),
        params["w1"].T,                                    # (D, d_inner)
        params["b1"].astype(f32),
        params["w2"].T,                                    # (d_inner, D)
        params["b2"].astype(f32),
        params["ln2_g"].astype(f32), params["ln2_b"].astype(f32),
    )
    # TODO(synk): for d_head < 128, zero-padding Dh in wq/wk/wv (+ matching wo rows)
    # would raise MXU utilization on the attention matmuls (v5e: pad to 128).
    wdtype = weights[0].dtype
    wsize = wdtype.itemsize
    wbytes = sum(int(w.size) * w.dtype.itemsize for w in weights)

    # VMEM budget: cap below physical VMEM of the current generation (v7x = 64 MiB).
    try:
        hw_vmem = int(getattr(pltpu.get_tpu_info(), "vmem_capacity_bytes"))
    except Exception:
        hw_vmem = 64 << 20                                  # conservative (v7x) fallback
    vmem_cap = int(0.85 * hw_vmem)

    w_buf = 1 if single_buffer_weights else 2
    kv_scr_bytes = 2 * n_head * _round_up(S, 8) * _round_up(d_head, 128) * wsize
    ctx_bytes = 2 * _round_up(S, 8) * _round_up(D, 128) * itemsize   # double-buffered in
    fixed_bytes = w_buf * wbytes + kv_scr_bytes + ctx_bytes + (4 << 20)

    # per-query-row f32 working set: score/exp block, head tensors, FF, residuals, out
    per_row = 4 * (2 * n_head * S + 3 * hd + 2 * d_inner + 8 * D) + 2 * D * itemsize
    tq = _pick_q_tile(S, q_block, per_row, max(vmem_cap - fixed_bytes, 1 << 20))
    n_q = S // tq
    vmem_limit = int(min(vmem_cap, max(fixed_bytes + tq * per_row, 16 << 20)))

    kernel = functools.partial(decoder_layer_kernel, n_head=n_head, d_head=d_head,
                               q_tile=tq, scale=1.0 / math.sqrt(d_head))

    # Batch outermost: context block index (b, 0, 0) is constant over the inner query
    # axis, so the full (S, D) context is DMA'd once per batch.
    hc_spec = pl.BlockSpec((None, S, D), lambda b, qi: (b, 0, 0))
    out_spec = pl.BlockSpec((None, tq, D), lambda b, qi: (b, qi, 0))

    def weight_spec(shape):
        idx = lambda b, qi, _n=len(shape): (0,) * _n
        if single_buffer_weights:
            # grid-invariant blocks: single buffer halves the weight VMEM footprint
            return pl.BlockSpec(shape, idx, pipeline_mode=pl.Buffered(1))
        return pl.BlockSpec(shape, idx)

    flops = 2 * B * (S * D * hd                       # Q projection
                     + 2 * S * D * hd                 # K/V projection (once per batch)
                     + 2 * n_head * S * S * d_head    # scores + PV
                     + S * hd * D                     # output projection
                     + 2 * S * D * d_inner)           # feed-forward
    transcendentals = B * n_head * S * S
    bytes_accessed = 2 * B * S * D * itemsize + wbytes

    call = pl.pallas_call(
        kernel,
        out_shape=jax.ShapeDtypeStruct((B, S, D), h_bsd.dtype),
        grid=(B, n_q),
        in_specs=[hc_spec] + [weight_spec(w.shape) for w in weights],
        out_specs=out_spec,
        scratch_shapes=[pltpu.VMEM((n_head, S, d_head), wdtype),   # K (H, S, Dh)
                        pltpu.VMEM((n_head, S, d_head), wdtype)],  # V (H, S, Dh)
        compiler_params=pltpu.CompilerParams(
            # batch "parallel" (megacore / v7x two-TC sharding); query axis "arbitrary"
            # so the per-batch K/V scratch written at qi == 0 is valid for all its tiles.
            dimension_semantics=("parallel", "arbitrary"),
            vmem_limit_bytes=vmem_limit),
        cost_estimate=pl.CostEstimate(flops=flops, transcendentals=transcendentals,
                                      bytes_accessed=bytes_accessed),
    )
    # TODO(synk): on v7x with B == 1 the "parallel" batch axis leaves one TensorCore
    # idle; split the query axis across cores with K/V precomputed in a separate call.
    try:
        return call(h_bsd, *weights)
    except Exception:
        if not single_buffer_weights:
            raise
        # Eager-only safety net; under jax.jit compile errors surface outside this frame,
        # so jitted callers should pass single_buffer_weights=False explicitly.
        return decoder_layer_bsd(h_bsd, params, n_head=n_head, d_head=d_head,
                                 q_block=q_block, single_buffer_weights=False)


def decoder_layer(h_sbd, params, *, n_head, d_head, q_block=None,
                  single_buffer_weights=None):
    """h_sbd: (S, B, D) like the PyTorch module. Returns (S, B, D).

    Callers that already hold batch-major (B, S, D) activations should call
    decoder_layer_bsd directly and skip the two host-side transposes below."""
    out_bsd = decoder_layer_bsd(jnp.transpose(h_sbd, (1, 0, 2)), params,
                                n_head=n_head, d_head=d_head, q_block=q_block,
                                single_buffer_weights=single_buffer_weights)
    return jnp.transpose(out_bsd, (1, 0, 2))


def reference_forward(h_sbd, params, *, n_head, d_head):
    """Plain-JAX reference mirroring the PyTorch forward semantics."""
    S, B, D = h_sbd.shape
    hd = n_head * d_head
    scale = 1.0 / math.sqrt(d_head)
    f32 = jnp.float32
    cdt = params["wq"].dtype

    h32 = h_sbd.astype(f32)
    hc = h32.astype(cdt)

    q = jnp.einsum("sbd,ed->sbe", hc, params["wq"], preferred_element_type=f32)
    kv = jnp.einsum("sbd,ed->sbe", hc, params["wkv"], preferred_element_type=f32)
    k, v = kv[..., :hd], kv[..., hd:]
    q = q.reshape(S, B, n_head, d_head).astype(cdt)
    k = k.reshape(S, B, n_head, d_head).astype(cdt)
    v = v.reshape(S, B, n_head, d_head).astype(cdt)

    score = jnp.einsum("ibnd,jbnd->ijbn", q, k, preferred_element_type=f32) * scale
    prob = jax.nn.softmax(score, axis=1)
    vec = jnp.einsum("ijbn,jbnd->ibnd", prob.astype(cdt), v,
                     preferred_element_type=f32).reshape(S, B, hd)
    attn_out = jnp.einsum("sbe,de->sbd", vec.astype(cdt), params["wo"],
                          preferred_element_type=f32)
    x = _layer_norm(h32 + attn_out, params["ln1_g"], params["ln1_b"])

    ff1 = jnp.maximum(
        jnp.einsum("sbd,ed->sbe", x.astype(cdt), params["w1"],
                   preferred_element_type=f32) + params["b1"], 0.0)
    ff2 = jnp.einsum("sbe,de->sbd", ff1.astype(cdt), params["w2"],
                     preferred_element_type=f32) + params["b2"]
    return _layer_norm(x + ff2, params["ln2_g"], params["ln2_b"])


def init_params(key, d_model, n_head, d_head, d_inner, dtype=jnp.float32):
    hd = n_head * d_head
    ks = jax.random.split(key, 6)
    scale = 0.1
    f32 = jnp.float32
    return {
        "wq":  (scale * jax.random.normal(ks[0], (hd, d_model), f32)).astype(dtype),
        "wkv": (scale * jax.random.normal(ks[1], (2 * hd, d_model), f32)).astype(dtype),
        "wo":  (scale * jax.random.normal(ks[2], (d_model, hd), f32)).astype(dtype),
        "ln1_g": jnp.ones((1, d_model), f32),
        "ln1_b": jnp.zeros((1, d_model), f32),
        "w1":  (scale * jax.random.normal(ks[3], (d_inner, d_model), f32)).astype(dtype),
        "b1":  scale * jax.random.normal(ks[4], (1, d_inner), f32),
        "w2":  (scale * jax.random.normal(ks[5], (d_model, d_inner), f32)).astype(dtype),
        "b2":  jnp.zeros((1, d_model), f32),
        "ln2_g": jnp.ones((1, d_model), f32),
        "ln2_b": jnp.zeros((1, d_model), f32),
    }


if __name__ == "__main__":
    # (seq, batch, d_model) like the PyTorch module
    S, B = 8, 2
    n_head, d_model, d_head, d_inner = 2, 32, 16, 64

    key = jax.random.PRNGKey(0)
    k_h, k_p = jax.random.split(key)
    h = jax.random.normal(k_h, (S, B, d_model), jnp.float32)

    # f32 end-to-end validation against the PyTorch-equivalent reference.
    # (bf16 weights are supported on real TPU MXUs -- pass bf16 params to
    #  decoder_layer -- but not exercised here because some host/interpret backends
    #  reject BF16 x BF16 = F32 dots.)
    params = init_params(k_p, d_model, n_head, d_head, d_inner, jnp.float32)
    out = jax.block_until_ready(decoder_layer(h, params, n_head=n_head, d_head=d_head))
    ref = reference_forward(h, params, n_head=n_head, d_head=d_head)
    assert out.shape == (S, B, d_model)
    max_err = jnp.max(jnp.abs(out - ref))
    # tolerance covers the EUP approximate-reciprocal softmax denominator
    assert jnp.allclose(out, ref, atol=1e-2, rtol=1e-2), f"max err {max_err}"

    print("KERNEL_OK")
</pallas_src>

<mosaic_0001>
module attributes {stable_mosaic.version = 11 : i64} {
  func.func @decoder_layer_kernel(%arg0: i32, %arg1: i32, %arg2: memref<1x8x32xf32, #tpu.memory_space<vmem>>, %arg3: memref<32x32xf32, #tpu.memory_space<vmem>>, %arg4: memref<32x32xf32, #tpu.memory_space<vmem>>, %arg5: memref<32x32xf32, #tpu.memory_space<vmem>>, %arg6: memref<32x32xf32, #tpu.memory_space<vmem>>, %arg7: memref<1x32xf32, #tpu.memory_space<vmem>>, %arg8: memref<1x32xf32, #tpu.memory_space<vmem>>, %arg9: memref<32x64xf32, #tpu.memory_space<vmem>>, %arg10: memref<1x64xf32, #tpu.memory_space<vmem>>, %arg11: memref<64x32xf32, #tpu.memory_space<vmem>>, %arg12: memref<1x32xf32, #tpu.memory_space<vmem>>, %arg13: memref<1x32xf32, #tpu.memory_space<vmem>>, %arg14: memref<1x32xf32, #tpu.memory_space<vmem>>, %arg15: memref<1x8x32xf32, #tpu.memory_space<vmem>>, %arg16: memref<2x8x16xf32, #tpu.memory_space<vmem>>, %arg17: memref<2x8x16xf32, #tpu.memory_space<vmem>>) attributes {dimension_semantics = [#tpu.dimension_semantics<parallel>, #tpu.dimension_semantics<arbitrary>], iteration_bounds = array<i64: 2, 1>, scalar_prefetch = 0 : i64, scratch_operands = 2 : i64, tpu.core_type = #tpu.core_type<tc>, window_params = [{transform_indices = @transform_0, window_bounds = array<i64: 1, 8, 32>}, {pipeline_mode = #tpu.pipeline_mode<synchronous>, transform_indices = @transform_1, window_bounds = array<i64: 32, 32>}, {pipeline_mode = #tpu.pipeline_mode<synchronous>, transform_indices = @transform_2, window_bounds = array<i64: 32, 32>}, {pipeline_mode = #tpu.pipeline_mode<synchronous>, transform_indices = @transform_3, window_bounds = array<i64: 32, 32>}, {pipeline_mode = #tpu.pipeline_mode<synchronous>, transform_indices = @transform_4, window_bounds = array<i64: 32, 32>}, {pipeline_mode = #tpu.pipeline_mode<synchronous>, transform_indices = @transform_5, window_bounds = array<i64: 1, 32>}, {pipeline_mode = #tpu.pipeline_mode<synchronous>, transform_indices = @transform_6, window_bounds = array<i64: 1, 32>}, {pipeline_mode = #tpu.pipeline_mode<synchronous>, transform_indices = @transform_7, window_bounds = array<i64: 32, 64>}, {pipeline_mode = #tpu.pipeline_mode<synchronous>, transform_indices = @transform_8, window_bounds = array<i64: 1, 64>}, {pipeline_mode = #tpu.pipeline_mode<synchronous>, transform_indices = @transform_9, window_bounds = array<i64: 64, 32>}, {pipeline_mode = #tpu.pipeline_mode<synchronous>, transform_indices = @transform_10, window_bounds = array<i64: 1, 32>}, {pipeline_mode = #tpu.pipeline_mode<synchronous>, transform_indices = @transform_11, window_bounds = array<i64: 1, 32>}, {pipeline_mode = #tpu.pipeline_mode<synchronous>, transform_indices = @transform_12, window_bounds = array<i64: 1, 32>}, {transform_indices = @transform_13, window_bounds = array<i64: 1, 8, 32>}]} {
    %c0_i32 = arith.constant 0 : i32
    %0 = arith.cmpi eq, %arg1, %c0_i32 : i32
    %1 = arith.extui %0 : i1 to i32
    %c0_i32_0 = arith.constant 0 : i32
    %2 = arith.cmpi ne, %1, %c0_i32_0 : i32
    scf.if %2 {
      %c0_50 = arith.constant 0 : index
      %c0_51 = arith.constant 0 : index
      %c0_52 = arith.constant 0 : index
      %97 = vector.load %arg2[%c0_50, %c0_51, %c0_52] : memref<1x8x32xf32, #tpu.memory_space<vmem>>, vector<1x8x32xf32>
      %98 = vector.shape_cast %97 : vector<1x8x32xf32> to vector<8x32xf32>
      %c0_53 = arith.constant 0 : index
      %c0_54 = arith.constant 0 : index
      %99 = vector.load %arg4[%c0_53, %c0_54] : memref<32x32xf32, #tpu.memory_space<vmem>>, vector<32x32xf32>
      %cst_55 = arith.constant dense<0.000000e+00> : vector<8x32xf32>
      %100 = tpu.matmul %98, %99, %cst_55 {dimension_numbers = #tpu.dot_dimension_numbers<[1], [0], [0], [1], [0, 0, 1, 1], [], []>} : vector<8x32xf32>, vector<32x32xf32>, vector<8x32xf32> -> vector<8x32xf32>
      %c0_56 = arith.constant 0 : index
      %c0_57 = arith.constant 0 : index
      %101 = vector.load %arg5[%c0_56, %c0_57] : memref<32x32xf32, #tpu.memory_space<vmem>>, vector<32x32xf32>
      %cst_58 = arith.constant dense<0.000000e+00> : vector<8x32xf32>
      %102 = tpu.matmul %98, %101, %cst_58 {dimension_numbers = #tpu.dot_dimension_numbers<[1], [0], [0], [1], [0, 0, 1, 1], [], []>} : vector<8x32xf32>, vector<32x32xf32>, vector<8x32xf32> -> vector<8x32xf32>
      %103 = vector.shape_cast %100 : vector<8x32xf32> to vector<8x2x16xf32>
      %104 = tpu.transpose %103, [1, 0, 2] : vector<8x2x16xf32> -> vector<2x8x16xf32>
      %c0_59 = arith.constant 0 : index
      %c0_60 = arith.constant 0 : index
      %c0_61 = arith.constant 0 : index
      %105 = vector.load %arg16[%c0_59, %c0_60, %c0_61] : memref<2x8x16xf32, #tpu.memory_space<vmem>>, vector<2x8x16xf32>
      tpu.vector_store %arg16[%c0_59, %c0_60, %c0_61], %104 {strides = array<i32>} : memref<2x8x16xf32, #tpu.memory_space<vmem>>, vector<2x8x16xf32>,
      %106 = vector.shape_cast %102 : vector<8x32xf32> to vector<8x2x16xf32>
      %107 = tpu.transpose %106, [1, 0, 2] : vector<8x2x16xf32> -> vector<2x8x16xf32>
      %c0_62 = arith.constant 0 : index
      %c0_63 = arith.constant 0 : index
      %c0_64 = arith.constant 0 : index
      %108 = vector.load %arg17[%c0_62, %c0_63, %c0_64] : memref<2x8x16xf32, #tpu.memory_space<vmem>>, vector<2x8x16xf32>
      tpu.vector_store %arg17[%c0_62, %c0_63, %c0_64], %107 {strides = array<i32>} : memref<2x8x16xf32, #tpu.memory_space<vmem>>, vector<2x8x16xf32>,
    } else {
    }
    %c8_i32 = arith.constant 8 : i32
    %3 = arith.muli %arg1, %c8_i32 : i32
    %4 = tpu.assume_multiple %3, 8 : i32
    %c0 = arith.constant 0 : index
    %5 = arith.index_cast %4 : i32 to index
    %c0_1 = arith.constant 0 : index
    %6 = vector.load %arg2[%c0, %5, %c0_1] : memref<1x8x32xf32, #tpu.memory_space<vmem>>, vector<1x8x32xf32>
    %7 = vector.shape_cast %6 : vector<1x8x32xf32> to vector<8x32xf32>
    %c0_2 = arith.constant 0 : index
    %c0_3 = arith.constant 0 : index
    %8 = vector.load %arg3[%c0_2, %c0_3] : memref<32x32xf32, #tpu.memory_space<vmem>>, vector<32x32xf32>
    %cst = arith.constant dense<0.000000e+00> : vector<8x32xf32>
    %9 = tpu.matmul %7, %8, %cst {dimension_numbers = #tpu.dot_dimension_numbers<[1], [0], [0], [1], [0, 0, 1, 1], [], []>} : vector<8x32xf32>, vector<32x32xf32>, vector<8x32xf32> -> vector<8x32xf32>
    %cst_4 = arith.constant 2.500000e-01 : f32
    %10 = vector.broadcast %cst_4 : f32 to vector<8x32xf32>
    %11 = arith.mulf %9, %10 : vector<8x32xf32>
    %12 = vector.shape_cast %11 : vector<8x32xf32> to vector<8x2x16xf32>
    %13 = tpu.transpose %12, [1, 0, 2] : vector<8x2x16xf32> -> vector<2x8x16xf32>
    %c0_5 = arith.constant 0 : index
    %c0_6 = arith.constant 0 : index
    %c0_7 = arith.constant 0 : index
    %14 = vector.load %arg16[%c0_5, %c0_6, %c0_7] : memref<2x8x16xf32, #tpu.memory_space<vmem>>, vector<2x8x16xf32>
    "tpu.trace_start"() <{level = 10 : i32, message = "hqd,hkd->hqk"}> : () -> ()
    %cst_8 = arith.constant dense<0.000000e+00> : vector<2x8x8xf32>
    %15 = tpu.matmul %13, %14, %cst_8 {dimension_numbers = #tpu.dot_dimension_numbers<[2], [2], [1], [1], [0, 0, 0, 1, 1, 1], [0], [0]>} : vector<2x8x16xf32>, vector<2x8x16xf32>, vector<2x8x8xf32> -> vector<2x8x8xf32>
    "tpu.trace_stop"() : () -> ()
    %cst_9 = arith.constant dense<0xFF800000> : vector<2x8xf32>
    %16 = vector.multi_reduction <maximumf>, %15, %cst_9 [2] : vector<2x8x8xf32> to vector<2x8xf32>
    %17 = vector.shape_cast %16 : vector<2x8xf32> to vector<2x8x1xf32>
    %18 = vector.broadcast %17 : vector<2x8x1xf32> to vector<2x8x8xf32>
    %19 = arith.subf %15, %18 : vector<2x8x8xf32>
    %20 = math.exp %19 : vector<2x8x8xf32>
    %cst_10 = arith.constant dense<0.000000e+00> : vector<2x8xf32>
    %21 = vector.multi_reduction <add>, %20, %cst_10 [2] : vector<2x8x8xf32> to vector<2x8xf32>
    %22 = vector.shape_cast %21 : vector<2x8xf32> to vector<2x8x1xf32>
    %c0_11 = arith.constant 0 : index
    %c0_12 = arith.constant 0 : index
    %c0_13 = arith.constant 0 : index
    %23 = vector.load %arg17[%c0_11, %c0_12, %c0_13] : memref<2x8x16xf32, #tpu.memory_space<vmem>>, vector<2x8x16xf32>
    "tpu.trace_start"() <{level = 10 : i32, message = "hqk,hkd->hqd"}> : () -> ()
    %cst_14 = arith.constant dense<0.000000e+00> : vector<2x8x16xf32>
    %24 = tpu.matmul %20, %23, %cst_14 {dimension_numbers = #tpu.dot_dimension_numbers<[2], [1], [1], [2], [0, 0, 0, 1, 1, 2], [0], [0]>} : vector<2x8x8xf32>, vector<2x8x16xf32>, vector<2x8x16xf32> -> vector<2x8x16xf32>
    "tpu.trace_stop"() : () -> ()
    %25 = tpu.reciprocal %22 {approx = true} : vector<2x8x1xf32> -> vector<2x8x1xf32>
    %26 = vector.broadcast %25 : vector<2x8x1xf32> to vector<2x8x16xf32>
    %27 = arith.mulf %24, %26 : vector<2x8x16xf32>
    %28 = tpu.transpose %27, [1, 0, 2] : vector<2x8x16xf32> -> vector<8x2x16xf32>
    %29 = vector.shape_cast %28 : vector<8x2x16xf32> to vector<8x32xf32>
    %c0_15 = arith.constant 0 : index
    %c0_16 = arith.constant 0 : index
    %30 = vector.load %arg6[%c0_15, %c0_16] : memref<32x32xf32, #tpu.memory_space<vmem>>, vector<32x32xf32>
    %cst_17 = arith.constant dense<0.000000e+00> : vector<8x32xf32>
    %31 = tpu.matmul %29, %30, %cst_17 {dimension_numbers = #tpu.dot_dimension_numbers<[1], [0], [0], [1], [0, 0, 1, 1], [], []>} : vector<8x32xf32>, vector<32x32xf32>, vector<8x32xf32> -> vector<8x32xf32>
    %32 = arith.addf %7, %31 : vector<8x32xf32>
    %c0_18 = arith.constant 0 : index
    %c0_19 = arith.constant 0 : index
    %33 = vector.load %arg7[%c0_18, %c0_19] : memref<1x32xf32, #tpu.memory_space<vmem>>, vector<1x32xf32>
    %c0_20 = arith.constant 0 : index
    %c0_21 = arith.constant 0 : index
    %34 = vector.load %arg8[%c0_20, %c0_21] : memref<1x32xf32, #tpu.memory_space<vmem>>, vector<1x32xf32>
    %cst_22 = arith.constant dense<0.000000e+00> : vector<8xf32>
    %35 = vector.multi_reduction <add>, %32, %cst_22 [1] : vector<8x32xf32> to vector<8xf32>
    %36 = vector.shape_cast %35 : vector<8xf32> to vector<8x1xf32>
    %cst_23 = arith.constant 3.200000e+01 : f32
    %37 = vector.broadcast %cst_23 : f32 to vector<8x1xf32>
    %38 = arith.divf %36, %37 : vector<8x1xf32>
    %39 = vector.broadcast %38 : vector<8x1xf32> to vector<8x32xf32>
    %40 = arith.subf %32, %39 : vector<8x32xf32>
    %41 = arith.mulf %40, %40 : vector<8x32xf32>
    %cst_24 = arith.constant dense<0.000000e+00> : vector<8xf32>
    %42 = vector.multi_reduction <add>, %41, %cst_24 [1] : vector<8x32xf32> to vector<8xf32>
    %43 = vector.shape_cast %42 : vector<8xf32> to vector<8x1xf32>
    %cst_25 = arith.constant 3.200000e+01 : f32
    %44 = vector.broadcast %cst_25 : f32 to vector<8x1xf32>
    %45 = arith.divf %43, %44 : vector<8x1xf32>
    %46 = vector.broadcast %38 : vector<8x1xf32> to vector<8x32xf32>
    %47 = arith.subf %32, %46 : vector<8x32xf32>
    %cst_26 = arith.constant 9.99999974E-6 : f32
    %48 = vector.broadcast %cst_26 : f32 to vector<8x1xf32>
    %49 = arith.addf %45, %48 : vector<8x1xf32>
    %50 = math.rsqrt %49 : vector<8x1xf32>
    %51 = vector.broadcast %50 : vector<8x1xf32> to vector<8x32xf32>
    %52 = arith.mulf %47, %51 : vector<8x32xf32>
    %53 = vector.broadcast %33 : vector<1x32xf32> to vector<8x32xf32>
    %54 = arith.mulf %52, %53 : vector<8x32xf32>
    %55 = vector.broadcast %34 : vector<1x32xf32> to vector<8x32xf32>
    %56 = arith.addf %54, %55 : vector<8x32xf32>
    %c0_27 = arith.constant 0 : index
    %c0_28 = arith.constant 0 : index
    %57 = vector.load %arg9[%c0_27, %c0_28] : memref<32x64xf32, #tpu.memory_space<vmem>>, vector<32x64xf32>
    %cst_29 = arith.constant dense<0.000000e+00> : vector<8x64xf32>
    %58 = tpu.matmul %56, %57, %cst_29 {dimension_numbers = #tpu.dot_dimension_numbers<[1], [0], [0], [1], [0, 0, 1, 1], [], []>} : vector<8x32xf32>, vector<32x64xf32>, vector<8x64xf32> -> vector<8x64xf32>
    %c0_30 = arith.constant 0 : index
    %c0_31 = arith.constant 0 : index
    %59 = vector.load %arg10[%c0_30, %c0_31] : memref<1x64xf32, #tpu.memory_space<vmem>>, vector<1x64xf32>
    %60 = vector.broadcast %59 : vector<1x64xf32> to vector<8x64xf32>
    %61 = arith.addf %58, %60 : vector<8x64xf32>
    %cst_32 = arith.constant 0.000000e+00 : f32
    %62 = vector.broadcast %cst_32 : f32 to vector<8x64xf32>
    %63 = arith.maximumf %61, %62 : vector<8x64xf32>
    %c0_33 = arith.constant 0 : index
    %c0_34 = arith.constant 0 : index
    %64 = vector.load %arg11[%c0_33, %c0_34] : memref<64x32xf32, #tpu.memory_space<vmem>>, vector<64x32xf32>
    %cst_35 = arith.constant dense<0.000000e+00> : vector<8x32xf32>
    %65 = tpu.matmul %63, %64, %cst_35 {dimension_numbers = #tpu.dot_dimension_numbers<[1], [0], [0], [1], [0, 0, 1, 1], [], []>} : vector<8x64xf32>, vector<64x32xf32>, vector<8x32xf32> -> vector<8x32xf32>
    %c0_36 = arith.constant 0 : index
    %c0_37 = arith.constant 0 : index
    %66 = vector.load %arg12[%c0_36, %c0_37] : memref<1x32xf32, #tpu.memory_space<vmem>>, vector<1x32xf32>
    %67 = vector.broadcast %66 : vector<1x32xf32> to vector<8x32xf32>
    %68 = arith.addf %65, %67 : vector<8x32xf32>
    %69 = arith.addf %56, %68 : vector<8x32xf32>
    %c0_38 = arith.constant 0 : index
    %c0_39 = arith.constant 0 : index
    %70 = vector.load %arg13[%c0_38, %c0_39] : memref<1x32xf32, #tpu.memory_space<vmem>>, vector<1x32xf32>
    %c0_40 = arith.constant 0 : index
    %c0_41 = arith.constant 0 : index
    %71 = vector.load %arg14[%c0_40, %c0_41] : memref<1x32xf32, #tpu.memory_space<vmem>>, vector<1x32xf32>
    %cst_42 = arith.constant dense<0.000000e+00> : vector<8xf32>
    %72 = vector.multi_reduction <add>, %69, %cst_42 [1] : vector<8x32xf32> to vector<8xf32>
    %73 = vector.shape_cast %72 : vector<8xf32> to vector<8x1xf32>
    %cst_43 = arith.constant 3.200000e+01 : f32
    %74 = vector.broadcast %cst_43 : f32 to vector<8x1xf32>
    %75 = arith.divf %73, %74 : vector<8x1xf32>
    %76 = vector.broadcast %75 : vector<8x1xf32> to vector<8x32xf32>
    %77 = arith.subf %69, %76 : vector<8x32xf32>
    %78 = arith.mulf %77, %77 : vector<8x32xf32>
    %cst_44 = arith.constant dense<0.000000e+00> : vector<8xf32>
    %79 = vector.multi_reduction <add>, %78, %cst_44 [1] : vector<8x32xf32> to vector<8xf32>
    %80 = vector.shape_cast %79 : vector<8xf32> to vector<8x1xf32>
    %cst_45 = arith.constant 3.200000e+01 : f32
    %81 = vector.broadcast %cst_45 : f32 to vector<8x1xf32>
    %82 = arith.divf %80, %81 : vector<8x1xf32>
    %83 = vector.broadcast %75 : vector<8x1xf32> to vector<8x32xf32>
    %84 = arith.subf %69, %83 : vector<8x32xf32>
    %cst_46 = arith.constant 9.99999974E-6 : f32
    %85 = vector.broadcast %cst_46 : f32 to vector<8x1xf32>
    %86 = arith.addf %82, %85 : vector<8x1xf32>
    %87 = math.rsqrt %86 : vector<8x1xf32>
    %88 = vector.broadcast %87 : vector<8x1xf32> to vector<8x32xf32>
    %89 = arith.mulf %84, %88 : vector<8x32xf32>
    %90 = vector.broadcast %70 : vector<1x32xf32> to vector<8x32xf32>
    %91 = arith.mulf %89, %90 : vector<8x32xf32>
    %92 = vector.broadcast %71 : vector<1x32xf32> to vector<8x32xf32>
    %93 = arith.addf %91, %92 : vector<8x32xf32>
    %c0_47 = arith.constant 0 : index
    %c0_48 = arith.constant 0 : index
    %c0_49 = arith.constant 0 : index
    %94 = vector.load %arg15[%c0_47, %c0_48, %c0_49] : memref<1x8x32xf32, #tpu.memory_space<vmem>>, vector<1x8x32xf32>
    %95 = vector.shape_cast %94 : vector<1x8x32xf32> to vector<8x32xf32>
    %96 = vector.shape_cast %93 : vector<8x32xf32> to vector<1x8x32xf32>
    tpu.vector_store %arg15[%c0_47, %c0_48, %c0_49], %96 {strides = array<i32>} : memref<1x8x32xf32, #tpu.memory_space<vmem>>, vector<1x8x32xf32>,
    return
  }
  func.func @transform_0(%arg0: i32, %arg1: i32) -> (i32, i32, i32) {
    %c0_i32 = arith.constant 0 : i32
    %c0_i32_0 = arith.constant 0 : i32
    %c0_i32_1 = arith.constant 0 : i32
    return %arg0, %c0_i32, %c0_i32_0 : i32, i32, i32
  }
  func.func @transform_1(%arg0: i32, %arg1: i32) -> (i32, i32) {
    %c0_i32 = arith.constant 0 : i32
    %c0_i32_0 = arith.constant 0 : i32
    %c0_i32_1 = arith.constant 0 : i32
    return %c0_i32, %c0_i32_0 : i32, i32
  }
  func.func @transform_2(%arg0: i32, %arg1: i32) -> (i32, i32) {
    %c0_i32 = arith.constant 0 : i32
    %c0_i32_0 = arith.constant 0 : i32
    %c0_i32_1 = arith.constant 0 : i32
    return %c0_i32, %c0_i32_0 : i32, i32
  }
  func.func @transform_3(%arg0: i32, %arg1: i32) -> (i32, i32) {
    %c0_i32 = arith.constant 0 : i32
    %c0_i32_0 = arith.constant 0 : i32
    %c0_i32_1 = arith.constant 0 : i32
    return %c0_i32, %c0_i32_0 : i32, i32
  }
  func.func @transform_4(%arg0: i32, %arg1: i32) -> (i32, i32) {
    %c0_i32 = arith.constant 0 : i32
    %c0_i32_0 = arith.constant 0 : i32
    %c0_i32_1 = arith.constant 0 : i32
    return %c0_i32, %c0_i32_0 : i32, i32
  }
  func.func @transform_5(%arg0: i32, %arg1: i32) -> (i32, i32) {
    %c0_i32 = arith.constant 0 : i32
    %c0_i32_0 = arith.constant 0 : i32
    %c0_i32_1 = arith.constant 0 : i32
    return %c0_i32, %c0_i32_0 : i32, i32
  }
  func.func @transform_6(%arg0: i32, %arg1: i32) -> (i32, i32) {
    %c0_i32 = arith.constant 0 : i32
    %c0_i32_0 = arith.constant 0 : i32
    %c0_i32_1 = arith.constant 0 : i32
    return %c0_i32, %c0_i32_0 : i32, i32
  }
  func.func @transform_7(%arg0: i32, %arg1: i32) -> (i32, i32) {
    %c0_i32 = arith.constant 0 : i32
    %c0_i32_0 = arith.constant 0 : i32
    %c0_i32_1 = arith.constant 0 : i32
    return %c0_i32, %c0_i32_0 : i32, i32
  }
  func.func @transform_8(%arg0: i32, %arg1: i32) -> (i32, i32) {
    %c0_i32 = arith.constant 0 : i32
    %c0_i32_0 = arith.constant 0 : i32
    %c0_i32_1 = arith.constant 0 : i32
    return %c0_i32, %c0_i32_0 : i32, i32
  }
  func.func @transform_9(%arg0: i32, %arg1: i32) -> (i32, i32) {
    %c0_i32 = arith.constant 0 : i32
    %c0_i32_0 = arith.constant 0 : i32
    %c0_i32_1 = arith.constant 0 : i32
    return %c0_i32, %c0_i32_0 : i32, i32
  }
  func.func @transform_10(%arg0: i32, %arg1: i32) -> (i32, i32) {
    %c0_i32 = arith.constant 0 : i32
    %c0_i32_0 = arith.constant 0 : i32
    %c0_i32_1 = arith.constant 0 : i32
    return %c0_i32, %c0_i32_0 : i32, i32
  }
  func.func @transform_11(%arg0: i32, %arg1: i32) -> (i32, i32) {
    %c0_i32 = arith.constant 0 : i32
    %c0_i32_0 = arith.constant 0 : i32
    %c0_i32_1 = arith.constant 0 : i32
    return %c0_i32, %c0_i32_0 : i32, i32
  }
  func.func @transform_12(%arg0: i32, %arg1: i32) -> (i32, i32) {
    %c0_i32 = arith.constant 0 : i32
    %c0_i32_0 = arith.constant 0 : i32
    %c0_i32_1 = arith.constant 0 : i32
    return %c0_i32, %c0_i32_0 : i32, i32
  }
  func.func @transform_13(%arg0: i32, %arg1: i32) -> (i32, i32, i32) {
    %c0_i32 = arith.constant 0 : i32
    %c0_i32_0 = arith.constant 0 : i32
    return %arg0, %arg1, %c0_i32 : i32, i32, i32
  }
}

module attributes {stable_mosaic.version = 11 : i64} {
  func.func @decoder_layer_kernel(%arg0: i32, %arg1: i32, %arg2: memref<1x8x32xf32, #tpu.memory_space<vmem>>, %arg3: memref<32x32xf32, #tpu.memory_space<vmem>>, %arg4: memref<32x32xf32, #tpu.memory_space<vmem>>, %arg5: memref<32x32xf32, #tpu.memory_space<vmem>>, %arg6: memref<32x32xf32, #tpu.memory_space<vmem>>, %arg7: memref<1x32xf32, #tpu.memory_space<vmem>>, %arg8: memref<1x32xf32, #tpu.memory_space<vmem>>, %arg9: memref<32x64xf32, #tpu.memory_space<vmem>>, %arg10: memref<1x64xf32, #tpu.memory_space<vmem>>, %arg11: memref<64x32xf32, #tpu.memory_space<vmem>>, %arg12: memref<1x32xf32, #tpu.memory_space<vmem>>, %arg13: memref<1x32xf32, #tpu.memory_space<vmem>>, %arg14: memref<1x32xf32, #tpu.memory_space<vmem>>, %arg15: memref<1x8x32xf32, #tpu.memory_space<vmem>>, %arg16: memref<2x8x16xf32, #tpu.memory_space<vmem>>, %arg17: memref<2x8x16xf32, #tpu.memory_space<vmem>>) attributes {dimension_semantics = [#tpu.dimension_semantics<parallel>, #tpu.dimension_semantics<arbitrary>], iteration_bounds = array<i64: 2, 1>, scalar_prefetch = 0 : i64, scratch_operands = 2 : i64, tpu.core_type = #tpu.core_type<tc>, window_params = [{transform_indices = @transform_0, window_bounds = array<i64: 1, 8, 32>}, {pipeline_mode = #tpu.pipeline_mode<synchronous>, transform_indices = @transform_1, window_bounds = array<i64: 32, 32>}, {pipeline_mode = #tpu.pipeline_mode<synchronous>, transform_indices = @transform_2, window_bounds = array<i64: 32, 32>}, {pipeline_mode = #tpu.pipeline_mode<synchronous>, transform_indices = @transform_3, window_bounds = array<i64: 32, 32>}, {pipeline_mode = #tpu.pipeline_mode<synchronous>, transform_indices = @transform_4, window_bounds = array<i64: 32, 32>}, {pipeline_mode = #tpu.pipeline_mode<synchronous>, transform_indices = @transform_5, window_bounds = array<i64: 1, 32>}, {pipeline_mode = #tpu.pipeline_mode<synchronous>, transform_indices = @transform_6, window_bounds = array<i64: 1, 32>}, {pipeline_mode = #tpu.pipeline_mode<synchronous>, transform_indices = @transform_7, window_bounds = array<i64: 32, 64>}, {pipeline_mode = #tpu.pipeline_mode<synchronous>, transform_indices = @transform_8, window_bounds = array<i64: 1, 64>}, {pipeline_mode = #tpu.pipeline_mode<synchronous>, transform_indices = @transform_9, window_bounds = array<i64: 64, 32>}, {pipeline_mode = #tpu.pipeline_mode<synchronous>, transform_indices = @transform_10, window_bounds = array<i64: 1, 32>}, {pipeline_mode = #tpu.pipeline_mode<synchronous>, transform_indices = @transform_11, window_bounds = array<i64: 1, 32>}, {pipeline_mode = #tpu.pipeline_mode<synchronous>, transform_indices = @transform_12, window_bounds = array<i64: 1, 32>}, {transform_indices = @transform_13, window_bounds = array<i64: 1, 8, 32>}]} {
    %c0_i32 = arith.constant 0 : i32
    %0 = arith.cmpi eq, %arg1, %c0_i32 : i32
    %1 = arith.extui %0 : i1 to i32
    %c0_i32_0 = arith.constant 0 : i32
    %2 = arith.cmpi ne, %1, %c0_i32_0 : i32
    scf.if %2 {
      %c0_50 = arith.constant 0 : index
      %c0_51 = arith.constant 0 : index
      %c0_52 = arith.constant 0 : index
      %97 = vector.load %arg2[%c0_50, %c0_51, %c0_52] : memref<1x8x32xf32, #tpu.memory_space<vmem>>, vector<1x8x32xf32>
      %98 = vector.shape_cast %97 : vector<1x8x32xf32> to vector<8x32xf32>
      %c0_53 = arith.constant 0 : index
      %c0_54 = arith.constant 0 : index
      %99 = vector.load %arg4[%c0_53, %c0_54] : memref<32x32xf32, #tpu.memory_space<vmem>>, vector<32x32xf32>
      %cst_55 = arith.constant dense<0.000000e+00> : vector<8x32xf32>
      %100 = tpu.matmul %98, %99, %cst_55 {dimension_numbers = #tpu.dot_dimension_numbers<[1], [0], [0], [1], [0, 0, 1, 1], [], []>} : vector<8x32xf32>, vector<32x32xf32>, vector<8x32xf32> -> vector<8x32xf32>
      %c0_56 = arith.constant 0 : index
      %c0_57 = arith.constant 0 : index
      %101 = vector.load %arg5[%c0_56, %c0_57] : memref<32x32xf32, #tpu.memory_space<vmem>>, vector<32x32xf32>
      %cst_58 = arith.constant dense<0.000000e+00> : vector<8x32xf32>
      %102 = tpu.matmul %98, %101, %cst_58 {dimension_numbers = #tpu.dot_dimension_numbers<[1], [0], [0], [1], [0, 0, 1, 1], [], []>} : vector<8x32xf32>, vector<32x32xf32>, vector<8x32xf32> -> vector<8x32xf32>
      %103 = vector.shape_cast %100 : vector<8x32xf32> to vector<8x2x16xf32>
      %104 = tpu.transpose %103, [1, 0, 2] : vector<8x2x16xf32> -> vector<2x8x16xf32>
      %c0_59 = arith.constant 0 : index
      %c0_60 = arith.constant 0 : index
      %c0_61 = arith.constant 0 : index
      %105 = vector.load %arg16[%c0_59, %c0_60, %c0_61] : memref<2x8x16xf32, #tpu.memory_space<vmem>>, vector<2x8x16xf32>
      tpu.vector_store %arg16[%c0_59, %c0_60, %c0_61], %104 {strides = array<i32>} : memref<2x8x16xf32, #tpu.memory_space<vmem>>, vector<2x8x16xf32>,
      %106 = vector.shape_cast %102 : vector<8x32xf32> to vector<8x2x16xf32>
      %107 = tpu.transpose %106, [1, 0, 2] : vector<8x2x16xf32> -> vector<2x8x16xf32>
      %c0_62 = arith.constant 0 : index
      %c0_63 = arith.constant 0 : index
      %c0_64 = arith.constant 0 : index
      %108 = vector.load %arg17[%c0_62, %c0_63, %c0_64] : memref<2x8x16xf32, #tpu.memory_space<vmem>>, vector<2x8x16xf32>
      tpu.vector_store %arg17[%c0_62, %c0_63, %c0_64], %107 {strides = array<i32>} : memref<2x8x16xf32, #tpu.memory_space<vmem>>, vector<2x8x16xf32>,
    } else {
    }
    %c8_i32 = arith.constant 8 : i32
    %3 = arith.muli %arg1, %c8_i32 : i32
    %4 = tpu.assume_multiple %3, 8 : i32
    %c0 = arith.constant 0 : index
    %5 = arith.index_cast %4 : i32 to index
    %c0_1 = arith.constant 0 : index
    %6 = vector.load %arg2[%c0, %5, %c0_1] : memref<1x8x32xf32, #tpu.memory_space<vmem>>, vector<1x8x32xf32>
    %7 = vector.shape_cast %6 : vector<1x8x32xf32> to vector<8x32xf32>
    %c0_2 = arith.constant 0 : index
    %c0_3 = arith.constant 0 : index
    %8 = vector.load %arg3[%c0_2, %c0_3] : memref<32x32xf32, #tpu.memory_space<vmem>>, vector<32x32xf32>
    %cst = arith.constant dense<0.000000e+00> : vector<8x32xf32>
    %9 = tpu.matmul %7, %8, %cst {dimension_numbers = #tpu.dot_dimension_numbers<[1], [0], [0], [1], [0, 0, 1, 1], [], []>} : vector<8x32xf32>, vector<32x32xf32>, vector<8x32xf32> -> vector<8x32xf32>
    %cst_4 = arith.constant 2.500000e-01 : f32
    %10 = vector.broadcast %cst_4 : f32 to vector<8x32xf32>
    %11 = arith.mulf %9, %10 : vector<8x32xf32>
    %12 = vector.shape_cast %11 : vector<8x32xf32> to vector<8x2x16xf32>
    %13 = tpu.transpose %12, [1, 0, 2] : vector<8x2x16xf32> -> vector<2x8x16xf32>
    %c0_5 = arith.constant 0 : index
    %c0_6 = arith.constant 0 : index
    %c0_7 = arith.constant 0 : index
    %14 = vector.load %arg16[%c0_5, %c0_6, %c0_7] : memref<2x8x16xf32, #tpu.memory_space<vmem>>, vector<2x8x16xf32>
    "tpu.trace_start"() <{level = 10 : i32, message = "hqd,hkd->hqk"}> : () -> ()
    %cst_8 = arith.constant dense<0.000000e+00> : vector<2x8x8xf32>
    %15 = tpu.matmul %13, %14, %cst_8 {dimension_numbers = #tpu.dot_dimension_numbers<[2], [2], [1], [1], [0, 0, 0, 1, 1, 1], [0], [0]>} : vector<2x8x16xf32>, vector<2x8x16xf32>, vector<2x8x8xf32> -> vector<2x8x8xf32>
    "tpu.trace_stop"() : () -> ()
    %cst_9 = arith.constant dense<0xFF800000> : vector<2x8xf32>
    %16 = vector.multi_reduction <maximumf>, %15, %cst_9 [2] : vector<2x8x8xf32> to vector<2x8xf32>
    %17 = vector.shape_cast %16 : vector<2x8xf32> to vector<2x8x1xf32>
    %18 = vector.broadcast %17 : vector<2x8x1xf32> to vector<2x8x8xf32>
    %19 = arith.subf %15, %18 : vector<2x8x8xf32>
    %20 = math.exp %19 : vector<2x8x8xf32>
    %cst_10 = arith.constant dense<0.000000e+00> : vector<2x8xf32>
    %21 = vector.multi_reduction <add>, %20, %cst_10 [2] : vector<2x8x8xf32> to vector<2x8xf32>
    %22 = vector.shape_cast %21 : vector<2x8xf32> to vector<2x8x1xf32>
    %c0_11 = arith.constant 0 : index
    %c0_12 = arith.constant 0 : index
    %c0_13 = arith.constant 0 : index
    %23 = vector.load %arg17[%c0_11, %c0_12, %c0_13] : memref<2x8x16xf32, #tpu.memory_space<vmem>>, vector<2x8x16xf32>
    "tpu.trace_start"() <{level = 10 : i32, message = "hqk,hkd->hqd"}> : () -> ()
    %cst_14 = arith.constant dense<0.000000e+00> : vector<2x8x16xf32>
    %24 = tpu.matmul %20, %23, %cst_14 {dimension_numbers = #tpu.dot_dimension_numbers<[2], [1], [1], [2], [0, 0, 0, 1, 1, 2], [0], [0]>} : vector<2x8x8xf32>, vector<2x8x16xf32>, vector<2x8x16xf32> -> vector<2x8x16xf32>
    "tpu.trace_stop"() : () -> ()
    %25 = tpu.reciprocal %22 {approx = true} : vector<2x8x1xf32> -> vector<2x8x1xf32>
    %26 = vector.broadcast %25 : vector<2x8x1xf32> to vector<2x8x16xf32>
    %27 = arith.mulf %24, %26 : vector<2x8x16xf32>
    %28 = tpu.transpose %27, [1, 0, 2] : vector<2x8x16xf32> -> vector<8x2x16xf32>
    %29 = vector.shape_cast %28 : vector<8x2x16xf32> to vector<8x32xf32>
    %c0_15 = arith.constant 0 : index
    %c0_16 = arith.constant 0 : index
    %30 = vector.load %arg6[%c0_15, %c0_16] : memref<32x32xf32, #tpu.memory_space<vmem>>, vector<32x32xf32>
    %cst_17 = arith.constant dense<0.000000e+00> : vector<8x32xf32>
    %31 = tpu.matmul %29, %30, %cst_17 {dimension_numbers = #tpu.dot_dimension_numbers<[1], [0], [0], [1], [0, 0, 1, 1], [], []>} : vector<8x32xf32>, vector<32x32xf32>, vector<8x32xf32> -> vector<8x32xf32>
    %32 = arith.addf %7, %31 : vector<8x32xf32>
    %c0_18 = arith.constant 0 : index
    %c0_19 = arith.constant 0 : index
    %33 = vector.load %arg7[%c0_18, %c0_19] : memref<1x32xf32, #tpu.memory_space<vmem>>, vector<1x32xf32>
    %c0_20 = arith.constant 0 : index
    %c0_21 = arith.constant 0 : index
    %34 = vector.load %arg8[%c0_20, %c0_21] : memref<1x32xf32, #tpu.memory_space<vmem>>, vector<1x32xf32>
    %cst_22 = arith.constant dense<0.000000e+00> : vector<8xf32>
    %35 = vector.multi_reduction <add>, %32, %cst_22 [1] : vector<8x32xf32> to vector<8xf32>
    %36 = vector.shape_cast %35 : vector<8xf32> to vector<8x1xf32>
    %cst_23 = arith.constant 3.200000e+01 : f32
    %37 = vector.broadcast %cst_23 : f32 to vector<8x1xf32>
    %38 = arith.divf %36, %37 : vector<8x1xf32>
    %39 = vector.broadcast %38 : vector<8x1xf32> to vector<8x32xf32>
    %40 = arith.subf %32, %39 : vector<8x32xf32>
    %41 = arith.mulf %40, %40 : vector<8x32xf32>
    %cst_24 = arith.constant dense<0.000000e+00> : vector<8xf32>
    %42 = vector.multi_reduction <add>, %41, %cst_24 [1] : vector<8x32xf32> to vector<8xf32>
    %43 = vector.shape_cast %42 : vector<8xf32> to vector<8x1xf32>
    %cst_25 = arith.constant 3.200000e+01 : f32
    %44 = vector.broadcast %cst_25 : f32 to vector<8x1xf32>
    %45 = arith.divf %43, %44 : vector<8x1xf32>
    %46 = vector.broadcast %38 : vector<8x1xf32> to vector<8x32xf32>
    %47 = arith.subf %32, %46 : vector<8x32xf32>
    %cst_26 = arith.constant 9.99999974E-6 : f32
    %48 = vector.broadcast %cst_26 : f32 to vector<8x1xf32>
    %49 = arith.addf %45, %48 : vector<8x1xf32>
    %50 = math.rsqrt %49 : vector<8x1xf32>
    %51 = vector.broadcast %50 : vector<8x1xf32> to vector<8x32xf32>
    %52 = arith.mulf %47, %51 : vector<8x32xf32>
    %53 = vector.broadcast %33 : vector<1x32xf32> to vector<8x32xf32>
    %54 = arith.mulf %52, %53 : vector<8x32xf32>
    %55 = vector.broadcast %34 : vector<1x32xf32> to vector<8x32xf32>
    %56 = arith.addf %54, %55 : vector<8x32xf32>
    %c0_27 = arith.constant 0 : index
    %c0_28 = arith.constant 0 : index
    %57 = vector.load %arg9[%c0_27, %c0_28] : memref<32x64xf32, #tpu.memory_space<vmem>>, vector<32x64xf32>
    %cst_29 = arith.constant dense<0.000000e+00> : vector<8x64xf32>
    %58 = tpu.matmul %56, %57, %cst_29 {dimension_numbers = #tpu.dot_dimension_numbers<[1], [0], [0], [1], [0, 0, 1, 1], [], []>} : vector<8x32xf32>, vector<32x64xf32>, vector<8x64xf32> -> vector<8x64xf32>
    %c0_30 = arith.constant 0 : index
    %c0_31 = arith.constant 0 : index
    %59 = vector.load %arg10[%c0_30, %c0_31] : memref<1x64xf32, #tpu.memory_space<vmem>>, vector<1x64xf32>
    %60 = vector.broadcast %59 : vector<1x64xf32> to vector<8x64xf32>
    %61 = arith.addf %58, %60 : vector<8x64xf32>
    %cst_32 = arith.constant 0.000000e+00 : f32
    %62 = vector.broadcast %cst_32 : f32 to vector<8x64xf32>
    %63 = arith.maximumf %61, %62 : vector<8x64xf32>
    %c0_33 = arith.constant 0 : index
    %c0_34 = arith.constant 0 : index
    %64 = vector.load %arg11[%c0_33, %c0_34] : memref<64x32xf32, #tpu.memory_space<vmem>>, vector<64x32xf32>
    %cst_35 = arith.constant dense<0.000000e+00> : vector<8x32xf32>
    %65 = tpu.matmul %63, %64, %cst_35 {dimension_numbers = #tpu.dot_dimension_numbers<[1], [0], [0], [1], [0, 0, 1, 1], [], []>} : vector<8x64xf32>, vector<64x32xf32>, vector<8x32xf32> -> vector<8x32xf32>
    %c0_36 = arith.constant 0 : index
    %c0_37 = arith.constant 0 : index
    %66 = vector.load %arg12[%c0_36, %c0_37] : memref<1x32xf32, #tpu.memory_space<vmem>>, vector<1x32xf32>
    %67 = vector.broadcast %66 : vector<1x32xf32> to vector<8x32xf32>
    %68 = arith.addf %65, %67 : vector<8x32xf32>
    %69 = arith.addf %56, %68 : vector<8x32xf32>
    %c0_38 = arith.constant 0 : index
    %c0_39 = arith.constant 0 : index
    %70 = vector.load %arg13[%c0_38, %c0_39] : memref<1x32xf32, #tpu.memory_space<vmem>>, vector<1x32xf32>
    %c0_40 = arith.constant 0 : index
    %c0_41 = arith.constant 0 : index
    %71 = vector.load %arg14[%c0_40, %c0_41] : memref<1x32xf32, #tpu.memory_space<vmem>>, vector<1x32xf32>
    %cst_42 = arith.constant dense<0.000000e+00> : vector<8xf32>
    %72 = vector.multi_reduction <add>, %69, %cst_42 [1] : vector<8x32xf32> to vector<8xf32>
    %73 = vector.shape_cast %72 : vector<8xf32> to vector<8x1xf32>
    %cst_43 = arith.constant 3.200000e+01 : f32
    %74 = vector.broadcast %cst_43 : f32 to vector<8x1xf32>
    %75 = arith.divf %73, %74 : vector<8x1xf32>
    %76 = vector.broadcast %75 : vector<8x1xf32> to vector<8x32xf32>
    %77 = arith.subf %69, %76 : vector<8x32xf32>
    %78 = arith.mulf %77, %77 : vector<8x32xf32>
    %cst_44 = arith.constant dense<0.000000e+00> : vector<8xf32>
    %79 = vector.multi_reduction <add>, %78, %cst_44 [1] : vector<8x32xf32> to vector<8xf32>
    %80 = vector.shape_cast %79 : vector<8xf32> to vector<8x1xf32>
    %cst_45 = arith.constant 3.200000e+01 : f32
    %81 = vector.broadcast %cst_45 : f32 to vector<8x1xf32>
    %82 = arith.divf %80, %81 : vector<8x1xf32>
    %83 = vector.broadcast %75 : vector<8x1xf32> to vector<8x32xf32>
    %84 = arith.subf %69, %83 : vector<8x32xf32>
    %cst_46 = arith.constant 9.99999974E-6 : f32
    %85 = vector.broadcast %cst_46 : f32 to vector<8x1xf32>
    %86 = arith.addf %82, %85 : vector<8x1xf32>
    %87 = math.rsqrt %86 : vector<8x1xf32>
    %88 = vector.broadcast %87 : vector<8x1xf32> to vector<8x32xf32>
    %89 = arith.mulf %84, %88 : vector<8x32xf32>
    %90 = vector.broadcast %70 : vector<1x32xf32> to vector<8x32xf32>
    %91 = arith.mulf %89, %90 : vector<8x32xf32>
    %92 = vector.broadcast %71 : vector<1x32xf32> to vector<8x32xf32>
    %93 = arith.addf %91, %92 : vector<8x32xf32>
    %c0_47 = arith.constant 0 : index
    %c0_48 = arith.constant 0 : index
    %c0_49 = arith.constant 0 : index
    %94 = vector.load %arg15[%c0_47, %c0_48, %c0_49] : memref<1x8x32xf32, #tpu.memory_space<vmem>>, vector<1x8x32xf32>
    %95 = vector.shape_cast %94 : vector<1x8x32xf32> to vector<8x32xf32>
    %96 = vector.shape_cast %93 : vector<8x32xf32> to vector<1x8x32xf32>
    tpu.vector_store %arg15[%c0_47, %c0_48, %c0_49], %96 {strides = array<i32>} : memref<1x8x32xf32, #tpu.memory_space<vmem>>, vector<1x8x32xf32>,
    return
  }
  func.func @transform_0(%arg0: i32, %arg1: i32) -> (i32, i32, i32) {
    %c0_i32 = arith.constant 0 : i32
    %c0_i32_0 = arith.constant 0 : i32
    %c0_i32_1 = arith.constant 0 : i32
    return %arg0, %c0_i32, %c0_i32_0 : i32, i32, i32
  }
  func.func @transform_1(%arg0: i32, %arg1: i32) -> (i32, i32) {
    %c0_i32 = arith.constant 0 : i32
    %c0_i32_0 = arith.constant 0 : i32
    %c0_i32_1 = arith.constant 0 : i32
    return %c0_i32, %c0_i32_0 : i32, i32
  }
  func.func @transform_2(%arg0: i32, %arg1: i32) -> (i32, i32) {
    %c0_i32 = arith.constant 0 : i32
    %c0_i32_0 = arith.constant 0 : i32
    %c0_i32_1 = arith.constant 0 : i32
    return %c0_i32, %c0_i32_0 : i32, i32
  }
  func.func @transform_3(%arg0: i32, %arg1: i32) -> (i32, i32) {
    %c0_i32 = arith.constant 0 : i32
    %c0_i32_0 = arith.constant 0 : i32
    %c0_i32_1 = arith.constant 0 : i32
    return %c0_i32, %c0_i32_0 : i32, i32
  }
  func.func @transform_4(%arg0: i32, %arg1: i32) -> (i32, i32) {
    %c0_i32 = arith.constant 0 : i32
    %c0_i32_0 = arith.constant 0 : i32
    %c0_i32_1 = arith.constant 0 : i32
    return %c0_i32, %c0_i32_0 : i32, i32
  }
  func.func @transform_5(%arg0: i32, %arg1: i32) -> (i32, i32) {
    %c0_i32 = arith.constant 0 : i32
    %c0_i32_0 = arith.constant 0 : i32
    %c0_i32_1 = arith.constant 0 : i32
    return %c0_i32, %c0_i32_0 : i32, i32
  }
  func.func @transform_6(%arg0: i32, %arg1: i32) -> (i32, i32) {
    %c0_i32 = arith.constant 0 : i32
    %c0_i32_0 = arith.constant 0 : i32
    %c0_i32_1 = arith.constant 0 : i32
    return %c0_i32, %c0_i32_0 : i32, i32
  }
  func.func @transform_7(%arg0: i32, %arg1: i32) -> (i32, i32) {
    %c0_i32 = arith.constant 0 : i32
    %c0_i32_0 = arith.constant 0 : i32
    %c0_i32_1 = arith.constant 0 : i32
    return %c0_i32, %c0_i32_0 : i32, i32
  }
  func.func @transform_8(%arg0: i32, %arg1: i32) -> (i32, i32) {
    %c0_i32 = arith.constant 0 : i32
    %c0_i32_0 = arith.constant 0 : i32
    %c0_i32_1 = arith.constant 0 : i32
    return %c0_i32, %c0_i32_0 : i32, i32
  }
  func.func @transform_9(%arg0: i32, %arg1: i32) -> (i32, i32) {
    %c0_i32 = arith.constant 0 : i32
    %c0_i32_0 = arith.constant 0 : i32
    %c0_i32_1 = arith.constant 0 : i32
    return %c0_i32, %c0_i32_0 : i32, i32
  }
  func.func @transform_10(%arg0: i32, %arg1: i32) -> (i32, i32) {
    %c0_i32 = arith.constant 0 : i32
    %c0_i32_0 = arith.constant 0 : i32
    %c0_i32_1 = arith.constant 0 : i32
    return %c0_i32, %c0_i32_0 : i32, i32
  }
  func.func @transform_11(%arg0: i32, %arg1: i32) -> (i32, i32) {
    %c0_i32 = arith.constant 0 : i32
    %c0_i32_0 = arith.constant 0 : i32
    %c0_i32_1 = arith.constant 0 : i32
    return %c0_i32, %c0_i32_0 : i32, i32
  }
  func.func @transform_12(%arg0: i32, %arg1: i32) -> (i32, i32) {
    %c0_i32 = arith.constant 0 : i32
    %c0_i32_0 = arith.constant 0 : i32
    %c0_i32_1 = arith.constant 0 : i32
    return %c0_i32, %c0_i32_0 : i32, i32
  }
  func.func @transform_13(%arg0: i32, %arg1: i32) -> (i32, i32, i32) {
    %c0_i32 = arith.constant 0 : i32
    %c0_i32_0 = arith.constant 0 : i32
    return %arg0, %arg1, %c0_i32 : i32, i32, i32
  }
}

</mosaic_0001>

<bundles_post_ra>
// kernel: tpu_custom_call.1
= control target key start
LH: loop header
LB: loop body
LE: loop exit
PB: predicated region body
PF: predicated region fallthrough
CT: control target
= control target key end

     0   :  { %s3127_s0 = inlined_call_operand.hbm [shape: f32[2,8,32], index: 0, kind: input, shape index: {}]   ;;  %s3128_s1 = inlined_call_operand.vmem [shape: f32[32,32], index: 1, kind: input, shape index: {}]   ;;  %s3129_s2 = inlined_call_operand.vmem [shape: f32[32,32], index: 2, kind: input, shape index: {}]   ;;  %s3130_s3 = inlined_call_operand.vmem [shape: f32[32,32], index: 3, kind: input, shape index: {}]   ;;  %s3131_s4 = inlined_call_operand.hbm [shape: f32[32,32], index: 4, kind: input, shape index: {}]   ;;  %s3132_s5 = inlined_call_operand.vmem [shape: f32[1,32], index: 5, kind: input, shape index: {}]   ;;  %s3133_s6 = inlined_call_operand.vmem [shape: f32[1,32], index: 6, kind: input, shape index: {}]   ;;  %s3134_s7 = inlined_call_operand.hbm [shape: f32[32,64], index: 7, kind: input, shape index: {}]   ;;  %s3135_s8 = inlined_call_operand.hbm [shape: f32[1,64], index: 8, kind: input, shape index: {}]   ;;  %s3136_s9 = inlined_call_operand.vmem [shape: f32[64,32], index: 9, kind: input, shape index: {}]   ;;  %s3137_s10 = inlined_call_operand.vmem [shape: f32[1,32], index: 10, kind: input, shape index: {}]   ;;  %s3138_s11 = inlined_call_operand.vmem [shape: f32[1,32], index: 11, kind: input, shape index: {}]   ;;  %s3139_s12 = inlined_call_operand.vmem [shape: f32[1,32], index: 12, kind: input, shape index: {}]   ;;  %s3140_s13 = inlined_call_operand.hbm [shape: f32[2,8,32], index: 13, kind: output, shape index: {}]  }
   0x1   :  { %3149 = sst [smem:[#allocation20_spill]] %s3132_s5 }
   0x2   :  { %3150 = sst [smem:[#allocation21_spill]] %s3133_s6 }
   0x3   :  { %3151 = sst [smem:[#allocation22_spill]] %s3136_s9 }
   0x4   :  { %3152 = sst [smem:[#allocation23_spill]] %s3137_s10 }
   0x5   :  { %3153 = sst [smem:[#allocation24_spill]] %s3138_s11 }
   0x6   :  { %3154 = sst [smem:[#allocation25_spill]] %s3139_s12 }
   0x7   :  { %3155 = sst [smem:[#allocation26_spill]] %s3140_s13 }
   0x8   :  { %18 = vsyncpa [#allocation5], 0 }
   0x9   :  { %20 = vsyncpa [#allocation5 + $0x1], 0 }
   0xa   :  { %21 = vsyncpa [#allocation8], 0 }
   0xb   :  { %22 = vsyncpa [#allocation11], 0 }
   0xc   :  { %23 = vsyncpa [#allocation6], 0 }
   0xd   :  { %25 = vsyncpa [#allocation6 + $0x1], 0  ;;  %s2628_s25 = smov 0   ;;  %s2630_s26 = smov 0  }
   0xe   :  { %s2632_s27 = smov 0   ;;  %s2634_s28 = smov 0  }
   0xf   :  { %s2636_s29 = smov 0   ;;  %s2638_s30 = smov 0  }
  0x10 LB: > { %3156 = sst [smem:[#allocation17_spill]] %s2522_s25  ;;  %s2001_s14 = sadd.s32 4294967295, %s2542_s30   ;;  %s2542_s30 = sphi %s2638_s30, %s31_s30   ;;  %s2538_s29 = sphi %s2636_s29, %s3190_s29   ;;  %s2534_s28 = sphi %s2634_s28, %s3189_s28   ;;  %s2530_s27 = sphi %s2632_s27, %s3188_s27   ;;  %s2526_s26 = sphi %s2630_s26, %s3187_s26   ;;  %s2522_s25 = sphi %s2628_s25, %s3186_s25  }
  0x11   : > { %3157 = sst [smem:[#allocation18_spill]] %s2534_s28  ;;  %s2002_s15 = sadd.s32 4294967294, %s2542_s30  }
  0x12   : > { %p63_p0 = scmp.ne.s32.totalorder %s2526_s26, %s2522_s25  ;;  %p2662_p1 = scmp.eq.s32.totalorder %s2001_s14, 0 }
  0x13   : > { %p2666_p2 = scmp.eq.s32.totalorder %s2001_s14, 1  ;;  %p347_p3 = scmp.eq.s32.totalorder %s2002_s15, 1 }
  0x14   : > { %s3158_s16 = scalar_select %p2662_p1, 1, 0 }
  0x15   : > { %s3159_s17 = scalar_select %p2666_p2, 1, 0 }
  0x16   : > { %p2672_p4 = por %p2662_p1, %p63_p0  ;;  %p2003_p5 = scmp.ge.s32.totalorder %s2542_s30, 1 }
  0x17   : > { %p2677_p6 = por %p347_p3, %p63_p0  ;;  %p354_p7 = scmp.lt.s32.totalorder %s2542_s30, 3 }
  0x18   : > { %s3160_s18 = scalar_select %p2672_p4, 1, 0 }
  0x19   : > { %s3161_s19 = scalar_select %p2677_p6, 1, 0 }
  0x1a   : > { %p2682_p8 = pnand %p2003_p5, %p354_p7  ;;  %s2544_s21 = smov [#allocation7]  }
  0x1b   : > { %3162 = sst [smem:[#allocation19_spill]] %s3161_s19  ;;  %s375_s22 = sshll.u32 %s2544_s21, 4  ;;  %s2686_s22 = int_to_ptr.vmem [resolvable:$true] %s375_s22 }
  0x1c   : > { %s3163_s20 = scalar_select %p2682_p8, 1, 0 }
  0x1d   : > { %p2240_p9 = pneg %p2682_p8  ;;  %s2545_s24 = smov [#allocation9]  }
  0x1e   : > { %s394_s14 = sshll.u32 %s2545_s24, 4  ;;  %s2546_s15 = smov [#allocation10]   ;;  %s2697_s14 = int_to_ptr.vmem [resolvable:$true] %s394_s14 }
  0x1f   : > { %p2693_p11 = pnand %p2240_p9, %p2662_p1  ;;  %s2699_s19 = sshll.u32 %s2546_s15, 4  ;;  %s409_s19 = int_to_ptr.vmem [resolvable:$true] %s2699_s19 }
  0x20   : > { %s2338_s13 = scalar_lea.hbm %s3131_s4, 512 }
  0x21   : > { %p2339_p12 = scmp.ne.s32.totalorder %s3131_s4, %s2338_s13  ;;  %p2709_p13 = pneg %p2693_p11 }
  0x22   : > { %p2345_p5 = scmp.lt.u32.totalorder %s2338_s13, %s3131_s4 }
  0x23   : > { %p2341_p0 = pnand %p2709_p13, %p2339_p12 }
  0x25   : > { %p2342_p3 = pneg %p2341_p0 }
  0x27   : > { %p2347_p7 = pnand %p2345_p5, %p2342_p3 }
  0x29   : > { %2350 = shalt.err (!%p2347_p7)
}
  0x2a   : > { %s2351_s11 = scalar_lea.vmem %s2686_s22, 512  ;;  %p2359_p1 = scmp.lt.s32.totalorder %s2686_s22, %s2686_s22 }
  0x2b   : > { %p2352_p9 = scmp.ne.s32.totalorder %s2686_s22, %s2351_s11  ;;  %p2360_p4 = scmp.lt.s32.totalorder %s2351_s11, %s2351_s11 }
  0x2d   : > { %p2354_p10 = pnand %p2352_p9, %p2709_p13  ;;  %p2361_p12 = por %p2360_p4, %p2359_p1 }
  0x2f   : > { %p2355_p6 = pneg %p2354_p10 }
  0x31   : > { %p2362_p0 = pnand %p2361_p12, %p2355_p6 }
  0x33   : > { %2365 = shalt.err (!%p2362_p0)
}
  0x34   : > { %s2547_s12 = smov 128   ;;  %s2548_s13 = smov 8  }
  0x35   : > { %2243 = dma.hbm_to_vmem [thread:$0]  (!%p2693_p11), %s3131_s4, 512, %s2686_s22, [#allocation8], %s2547_s12, %s2547_s12, %s2548_s13  }
  0x36   : > { %s2366_s10 = scalar_lea.hbm %s3134_s7, 512 }
  0x37   : > { %p2367_p1 = scmp.ne.s32.totalorder %s3134_s7, %s2366_s10  ;;  %p2373_p10 = scmp.lt.u32.totalorder %s2366_s10, %s3134_s7 }
  0x39   : > { %p2369_p4 = pnand %p2367_p1, %p2709_p13 }
  0x3b   : > { %p2370_p6 = pneg %p2369_p4 }
  0x3d   : > { %p2375_p3 = pnand %p2373_p10, %p2370_p6 }
  0x3f   : > { %2378 = shalt.err (!%p2375_p3)
}
  0x40   : > { %s2379_s22 = scalar_lea.vmem %s2697_s14, 512  ;;  %p2387_p12 = scmp.lt.s32.totalorder %s2697_s14, %s2697_s14 }
  0x41   : > { %p2380_p5 = scmp.ne.s32.totalorder %s2697_s14, %s2379_s22  ;;  %p2388_p0 = scmp.lt.s32.totalorder %s2379_s22, %s2379_s22 }
  0x43   : > { %p2382_p7 = pnand %p2380_p5, %p2709_p13  ;;  %p2389_p1 = por %p2388_p0, %p2387_p12 }
  0x45   : > { %p2383_p9 = pneg %p2382_p7 }
  0x47   : > { %p2390_p4 = pnand %p2389_p1, %p2383_p9 }
  0x49   : > { %2393 = shalt.err (!%p2390_p4)
}
  0x4a   : > { %2246 = dma.hbm_to_vmem [thread:$0]  (!%p2693_p11), %s3134_s7, 512, %s2697_s14, [#allocation8], %s2547_s12, %s2547_s12, %s2548_s13  }
  0x4b   : > { %s2394_s25 = scalar_lea.hbm %s3135_s8, 16 }
  0x4c   : > { %p2395_p6 = scmp.ne.s32.totalorder %s3135_s8, %s2394_s25  ;;  %p2401_p5 = scmp.lt.u32.totalorder %s2394_s25, %s3135_s8 }
  0x4e   : > { %p2397_p10 = pnand %p2395_p6, %p2709_p13 }
  0x50   : > { %p2398_p3 = pneg %p2397_p10 }
  0x52   : > { %p2403_p7 = pnand %p2401_p5, %p2398_p3 }
  0x54   : > { %2406 = shalt.err (!%p2403_p7)
}
  0x55   : > { %s2407_s22 = scalar_lea.vmem %s409_s19, 16  ;;  %s2414_s14 = scalar_lea.vmem %s409_s19, 32 }
  0x56   : > { %p2408_p9 = scmp.ne.s32.totalorder %s409_s19, %s2407_s22  ;;  %p2415_p1 = scmp.lt.s32.totalorder %s409_s19, %s409_s19 }
  0x57   : > { %p2416_p4 = scmp.lt.s32.totalorder %s2414_s14, %s2407_s22 }
  0x58   : > { %p2410_p12 = pnand %p2408_p9, %p2709_p13 }
  0x59   : > { %p2417_p8 = por %p2416_p4, %p2415_p1 }
  0x5a   : > { %p2411_p0 = pneg %p2410_p12 }
  0x5c   : > { %p2418_p2 = pnand %p2417_p8, %p2411_p0 }
  0x5e   : > { %2421 = shalt.err (!%p2418_p2)
}
  0x5f   : > { %2249 = dma.hbm_to_vmem [thread:$0]  (!%p2693_p11), %s3135_s8, 16, %s409_s19, [#allocation11]  }
  0x60   : > { %s50_s28 = sadd.s32 1, %s2530_s27  ;;  %s43_s5 = sadd.s32 1, %s2538_s29 }
  0x61   : > { %p57_p2 = scmp.ne.s32.totalorder %s2530_s27, %s2526_s26  ;;  %p45_p8 = scmp.ge.s32.totalorder %s43_s5, 2 }
  0x62   : > { %p58_p13 = scmp.eq.s32.totalorder %s2542_s30, 0  ;;  %p3166_p6 = scmp.ne.s32.totalorder %s3159_s17, 0 }
  0x63   : > { %p2261_p3 = scmp.lt.s32.totalorder %s2542_s30, 2  ;;  %s3192_s5 = smov (%p45_p8, %s43_s5), 0 }
  0x64   : > { %p2779_p10 = por %p3166_p6, %p57_p2  ;;  %p59_p5 = por %p58_p13, %p57_p2 }
  0x65   : > { %s431_s6 = sand.u32 1, %s2530_s27   ;;  %s47_s9 = ssub.s32 %s2538_s29, %s3192_s5 }
  0x66   : > { %p48_p7 = scmp.eq.s32.totalorder %s47_s9, 0  ;;  %s2008_s19 = sshll.u32 %s431_s6, 3 }
  0x67   : > { %s2009_s10 = sshll.u32 %s2538_s29, 7  ;;  %s435_s15 = scalar_lea.vmem [#allocation4], %s2008_s19 }
  0x68   : > { %s2791_s25 = scalar_select %p48_p7, %s2530_s27, %s50_s28  }
  0x69   : > { %s2796_s17 = scalar_lea.hbm %s3127_s0, %s2009_s10  ;;  %s442_s11 = sshll.u32 %s435_s15, 4  ;;  %s2798_s11 = int_to_ptr.vmem [resolvable:$true] %s442_s11 }
  0x6a   : > { %p2802_p11 = pnand %p2261_p3, %p59_p5  ;;  %s432_s14 = scalar_lea.sflag [#allocation5], %s431_s6 }
  0x6b   : > { %s2422_s12 = scalar_lea.hbm %s2796_s17, 128  ;;  %s2427_s9 = scalar_lea.hbm %s3127_s0, 256 }
  0x6c   : > { %p2423_p9 = scmp.ne.s32.totalorder %s2796_s17, %s2422_s12  ;;  %p2424_p12 = pneg %p2802_p11 }
  0x6d   : > { %p2428_p4 = scmp.lt.u32.totalorder %s2796_s17, %s3127_s0  ;;  %p2429_p2 = scmp.lt.u32.totalorder %s2427_s9, %s2422_s12 }
  0x6e   : > { %p2425_p0 = pnand %p2424_p12, %p2423_p9  ;;  %p2431_p13 = scmp.lt.u32.totalorder %s2422_s12, %s2796_s17 }
  0x6f   : > { %p2430_p8 = por %p2429_p2, %p2428_p4 }
  0x70   : > { %p2426_p1 = pneg %p2425_p0 }
  0x71   : > { %p2432_p6 = por %p2431_p13, %p2430_p8 }
  0x73   : > { %p2433_p3 = pnand %p2432_p6, %p2426_p1 }
  0x75   : > { %2436 = shalt.err (!%p2433_p3)
}
  0x76   : > { %s2437_s6 = scalar_lea.vmem %s2798_s11, 128  ;;  %s2549_s21 = smov [#allocation4]  }
  0x77   : > { %p2438_p5 = scmp.ne.s32.totalorder %s2798_s11, %s2437_s6  ;;  %s2442_s24 = sshll.u32 %s2549_s21, 4  ;;  %s2443_s24 = int_to_ptr.vmem [resolvable:$false] %s2442_s24 }
  0x78   : > { %s2444_s15 = scalar_lea.vmem %s2443_s24, 256  ;;  %p2445_p0 = scmp.lt.s32.totalorder %s2798_s11, %s2443_s24 }
  0x79   : > { %p2440_p7 = pnand %p2438_p5, %p2424_p12  ;;  %p2446_p4 = scmp.lt.s32.totalorder %s2444_s15, %s2437_s6 }
  0x7b   : > { %p2441_p9 = pneg %p2440_p7  ;;  %p2447_p2 = por %p2446_p4, %p2445_p0 }
  0x7d   : > { %p2448_p8 = pnand %p2447_p2, %p2441_p9 }
  0x7f   : > { %2451 = shalt.err (!%p2448_p8)
}
  0x80   : > { %2253 = dma.hbm_to_vmem [thread:$0]  (!%p2802_p11), %s2796_s17, 128, %s2798_s11, %s432_s14  }
  0x81   : > { %p3169_p1 = scmp.ne.s32.totalorder %s3163_s20, 0 }
  0x82   : > { %s2834_s12 = sand.u32 (!%p3169_p1), 1, %s2526_s26   ;;  %p3170_p12 = scmp.ne.s32.totalorder (!%p3169_p1), %s3160_s18, 0 }
  0x83   : > { %451 = sbr.rel (%p3169_p1) target bundleno = 2519 (0x9d7), region = 72  ;;  %s2011_s13 = sshll.u32 (!%p3169_p1), %s2834_s12, 3 }
  0x84   : > { %s454_s28 = scalar_lea.sflag (!%p3169_p1), [#allocation5], %s2834_s12  ;;  %s2840_s9 = scalar_lea.vmem (!%p3169_p1), [#allocation4], %s2011_s13 }
  0x8a   : > { %2505 = dma.done.wait (%p3170_p12), %s454_s28, 128  }
  0x8b   : > { %2507 = vsyncadd (%p3170_p12), %s454_s28, 4294967168  ;;  %p3171_p11 = scmp.ne.s32.totalorder %s3158_s16, 0 }
  0x8d   : > { %2509 = dma.done.wait (%p3171_p11), [#allocation8], 1024  }
  0x8e   : > { %2511 = vsyncadd (%p3171_p11), [#allocation8], 4294966272 }
  0x8f   : > { %2513 = dma.done.wait (%p3171_p11), [#allocation11], 16  }
  0x90   : > { %2515 = vsyncadd (%p3171_p11), [#allocation11], 4294967280  ;;  %v2550_v0 = vmov 0.0|0.0   ;;  %vm2551_vm0 = vmmov 0   ;;  %v2552_v1 = vmov 0.0   ;;  %v517_v2 = vld [vmem:[%s3129_s2] sm:$0xff]  ;;  %v677_v30 = vlaneseq }
  0x91   : > { %2182 = vmatprep.subr.bf16.mxu1 %v2550_v0  ;;  %2194 = vmatprep.subr.bf16.mxu0 %v2550_v0  ;;  %v518_v3 = vld [vmem:[%s3129_s2 + $0x8] sm:$0xff]  ;;  %v917_v4 = vld [vmem:[%s3128_s1] sm:$0xff]  ;;  %v519_v7 = vld [vmem:[%s3129_s2 + $0x10] sm:$0xff]  ;;  %vm521_vm1 = vcmask 261120   ;;  %s2553_s6 = smov 112   ;;  %vm789_vm2 = vcmask 130048  }
  0x92   : > { %2096 = vmatprep.mubr.msk.f32.mxu1 %vm2551_vm0, %v2552_v1  ;;  %2118 = vmatprep.mubr.msk.f32.mxu0 %vm2551_vm0, %v2552_v1  ;;  %v2183_v5 = vpack.c.bf16 %v518_v3, %v517_v2  ;;  %v918_v6 = vld [vmem:[%s3128_s1 + $0x8] sm:$0xff]  ;;  %v520_v8 = vld [vmem:[%s3129_s2 + $0x18] sm:$0xff]  ;;  %v919_v10 = vld [vmem:[%s3128_s1 + $0x10] sm:$0xff]  ;;  %v2554_v28 = vmov 1983009808   ;;  %v678_v32 = vshrl.u32 %v677_v30, 7 }
  0x93   : > { %v2195_v9 = vpack.c.bf16 %v918_v6, %v917_v4  ;;  %v920_v11 = vld [vmem:[%s3128_s1 + $0x18] sm:$0xff]  ;;  %v2186_v12 = vpack.c.bf16 %v520_v8, %v519_v7  ;;  %v2887_v14 = vld [vmem:[%s2840_s9] sm:$0xff]  ;;  %v597_v17 = vld [vmem:[%s3130_s3 + $0x10] sm:$0xff]  ;;  %v675_v29 = vunpack.c.l.s4 %v2554_v28  ;;  %v2555_v33 = vmov 1934713408   ;;  %s2556_s21 = smov 16  }
  0x94   : > { %2184 = vmatpush3.bf16.msra.mxu1 %v2183_v5  ;;  %v2198_v13 = vpack.c.bf16 %v920_v11, %v919_v10  ;;  %v595_v15 = vld [vmem:[%s3130_s3] sm:$0xff]  ;;  %v596_v16 = vld [vmem:[%s3130_s3 + $0x8] sm:$0xff]  ;;  %v598_v19 = vld [vmem:[%s3130_s3 + $0x18] sm:$0xff]  ;;  %v706_v34 = vunpack.c.l.s4 %v2555_v33  ;;  %vm1271_vm3 = vcmask 64512   ;;  %s3172_s28 = sld [smem:[#allocation22_spill]]  ;;  %s3174_s15 = sld [smem:[#allocation20_spill]] }
  0x95   : > { %2196 = vmatpush3.bf16.msra.mxu0 %v2195_v9  ;;  %2185 = vmatprep.subr.bf16.mxu1 %v2550_v0  ;;  %v2189_v18 = vpack.c.bf16 %v596_v16, %v595_v15  ;;  %v2192_v20 = vpack.c.bf16 %v598_v19, %v597_v17  ;;  %v676_v31 = vunpack.c.0.s8 %v675_v29  ;;  %s3175_s9 = sld [smem:[#allocation21_spill]]  ;;  %vm1771_vm4 = vcmask 523264   ;;  %s3176_s10 = sld [smem:[#allocation23_spill]] }
  0x96   : > { %2197 = vmatprep.subr.bf16.mxu0 %v2550_v0  ;;  %v707_v36 = vunpack.c.0.s8 %v706_v34  ;;  %s511_s16 = scalar_lea.vmem [#allocation12], %s2011_s13  ;;  %s3180_s19 = sld [smem:[#allocation26_spill]] }
  0x97   : > { %v2920_v35 = vsub.s32 %v676_v31, %v678_v32  ;;  %s1891_s11 = sshll.u32 %s511_s16, 4  ;;  %s2557_s13 = smov [#allocation12]   ;;  %s3079_s11 = int_to_ptr.vmem [resolvable:$true] %s1891_s11 }
  0x98   : > { %2187 = vmatpush3.bf16.msra.mxu1 %v2186_v12  ;;  %v2924_v40 = vsub.s32 %v707_v36, %v678_v32  ;;  %s2452_s24 = scalar_lea.vmem %s3079_s11, 128 }
  0x99   : > { %2199 = vmatpush3.bf16.msra.mxu0 %v2198_v13  ;;  %2188 = vmatprep.subr.bf16.mxu1 %v2550_v0  ;;  %p2453_p13 = scmp.ne.s32.totalorder %s3079_s11, %s2452_s24 }
  0x9a   : > { %2131 = vmatprep.subr.mxu0 %v2552_v1  ;;  %s3173_s18 = smov %s3172_s28 }
  0x9b   : > { %2097 = vmatmul.mubr.msk.f32.vlgmr.msra.gmra.mrb[0].mxu1 %vm521_vm1, %v2887_v14  ;;  %p2454_p6 = pnand %p2453_p13, %p2779_p10 }
  0x9c   : > { %2119 = vmatmul.mubr.msk.f32.vlgmr.msra.gmra.mrb[0].mxu0 %vm521_vm1, %v2887_v14  ;;  %2107 = vmatprep.mubr.msk.f32.mxu1 %vm2551_vm0, %v2552_v1 }
  0x9d   : > { %2133 = vmatprep.mubr.msk.f32.mxu0 %vm2551_vm0, %v2552_v1  ;;  %2190 = vmatpush3.bf16.msra.mxu1 %v2189_v18  ;;  %p2455_p3 = pneg %p2454_p6 }
  0x9e   : > { %2191 = vmatprep.subr.bf16.mxu1 %v2550_v0 }
  0xa1   : > { %2193 = vmatpush3.bf16.msra.mxu1 %v2192_v20 }
  0xa2   : > { %2121 = vmatprep.subr.mxu1 %v2552_v1 }
  0xa4   : > { %2108 = vmatmul.mubr.msk.f32.vlgmr.msra.gmra.mrb[2].mxu1 %vm521_vm1, %v2887_v14 }
  0xa5   : > { %2123 = vmatprep.mubr.msk.f32.mxu1 %vm2551_vm0, %v2552_v1 }
 0x16e   : > { %v591_v21 = vpop.f32.mrb[0].mxu1 }
 0x16f   : > { %670 = vrot.lane.b32.xlu0 %v591_v21, %s2553_s6  ;;  %v2098_v22 = vpop.f32.mrb[1].mxu1  ;;  %v991_v23 = vpop.f32.mrb[0].mxu0  ;;  %v673_v37 = vcombine.high %v591_v21, %v2552_v1  ;;  %v680_v39 = vrot.slane %v591_v21, %v2920_v35 }
 0x170   : > { %v995_v24 = vmul.f32 0.25, %v991_v23  ;;  %v2120_v25 = vpop.f32.mrb[1].mxu0 }
 0x171   : > { %v687_v43 = vrot.slane %v673_v37, %v2920_v35 }
 0x172   : > { %v1000_v47 = vcombine.high %v995_v24, %v2552_v1  ;;  %v1007_v53 = vrot.slane %v995_v24, %v2920_v35 }
 0x173   : > { %997 = vrot.lane.b32.xlu0 %v995_v24, %s2553_s6 }
 0x174   : > { %v1014_v60 = vrot.slane %v1000_v47, %v2920_v35 }
 0x177   : > { %v2917_v26 = vpop.f32.mrb[2].mxu1 }
 0x178   : > { %793 = vrot.lane.b32.xlu0 %v2917_v26, %s2553_s6  ;;  %v2109_v27 = vpop.f32.mrb[3].mxu1  ;;  %s3177_s6 = sld [smem:[#allocation18_spill]] }
 0x17e   : > { %s2043_s17 = sshll.u32 %s3177_s6, 7  ;;  %s2456_s6 = sshll.u32 %s2557_s13, 4  ;;  %s2457_s6 = int_to_ptr.vmem [resolvable:$false] %s2456_s6 }
 0x17f   : > { %p2459_p5 = scmp.lt.s32.totalorder %s3079_s11, %s2457_s6 }
 0x1e1   : > { %v671_v38 = vpop.permute.xlu0 %670 }
 0x1e2   : > { %v688_v41 = vcombine.high %v671_v38, %v2552_v1  ;;  %v695_v42 = vrot.slane %v671_v38, %v2920_v35 }
 0x1e4   : > { %v702_v44 = vrot.slane %v688_v41, %v2920_v35  ;;  %v703_v45 = vcombine.low %v680_v39, %v695_v42  ;;  %v704_v46 = vcombine.high %v680_v39, %v695_v42  ;;  %v796_v39 = vcombine.high %v2917_v26, %v2552_v1 }
 0x1e5   : > { %v998_v48 = vpop.permute.xlu0 %997  ;;  %v803_v41 = vrot.slane %v2917_v26, %v2920_v35 }
 0x1e6   : > { %v711_v49 = vrot.slane %v703_v45, %v2924_v40  ;;  %v718_v50 = vrot.slane %v704_v46, %v2924_v40  ;;  %v719_v51 = vcombine.low %v687_v43, %v702_v44  ;;  %v720_v52 = vcombine.high %v687_v43, %v702_v44 }
 0x1e7   : > { %v1015_v54 = vcombine.high %v998_v48, %v2552_v1  ;;  %v1022_v55 = vrot.slane %v998_v48, %v2920_v35  ;;  %v810_v43 = vrot.slane %v796_v39, %v2920_v35 }
 0x1e8   : > { %v727_v56 = vrot.slane %v719_v51, %v2924_v40  ;;  %v734_v57 = vrot.slane %v720_v52, %v2924_v40  ;;  %v739_v58 = vcombine.low %v711_v49, %v718_v50  ;;  %v2018_v59 = vcombine.high %v711_v49, %v718_v50 }
 0x1e9   : > { %v1029_v61 = vrot.slane %v1015_v54, %v2920_v35  ;;  %v1030_v62 = vcombine.low %v1007_v53, %v1022_v55  ;;  %v1031_v63 = vcombine.high %v1007_v53, %v1022_v55 }
 0x1ea   : > { %v746_v2 = vrot.slane %v739_v58, %v2920_v35  ;;  %v754_v3 = vrot.slane %v2018_v59, %v2920_v35  ;;  %v755_v4 = vcombine.low %v727_v56, %v734_v57  ;;  %v2019_v5 = vcombine.high %v727_v56, %v734_v57  ;;  %v794_v42 = vpop.permute.xlu0 %793 }
 0x1eb   : > { %v1038_v6 = vrot.slane %v1030_v62, %v2924_v40  ;;  %v1045_v7 = vrot.slane %v1031_v63, %v2924_v40  ;;  %v1046_v8 = vcombine.low %v1014_v60, %v1029_v61  ;;  %v1047_v9 = vcombine.high %v1014_v60, %v1029_v61 }
 0x1ec   : > { %v762_v10 = vrot.slane %v755_v4, %v2920_v35  ;;  %v770_v11 = vrot.slane %v2019_v5, %v2920_v35  ;;  %v771_v12 = vcombine.low %v746_v2, %v754_v3  ;;  %v811_v44 = vcombine.high %v794_v42, %v2552_v1 }
 0x1ed   : > { %v1054_v13 = vrot.slane %v1046_v8, %v2924_v40  ;;  %v1061_v15 = vrot.slane %v1047_v9, %v2924_v40  ;;  %v1066_v17 = vcombine.low %v1038_v6, %v1045_v7  ;;  %v2023_v18 = vcombine.high %v1038_v6, %v1045_v7 }
 0x1ee   : > { %v779_v16 = vcombine.low %v762_v10, %v770_v11  ;;  %v778_v21 = vrot.slane %v771_v12, %v2924_v40  ;;  %v818_v45 = vrot.slane %v794_v42, %v2920_v35  ;;  %v825_v46 = vrot.slane %v811_v44, %v2920_v35 }
 0x1ef   : > { %v1082_v19 = vcombine.low %v1054_v13, %v1061_v15  ;;  %v2024_v20 = vcombine.high %v1054_v13, %v1061_v15  ;;  %v1073_v28 = vrot.slane %v1066_v17, %v2920_v35  ;;  %v1081_v29 = vrot.slane %v2023_v18, %v2920_v35 }
 0x1f0   : > { %v786_v22 = vrot.slane %v779_v16, %v2924_v40  ;;  %v826_v47 = vcombine.low %v803_v41, %v818_v45  ;;  %v827_v48 = vcombine.high %v803_v41, %v818_v45  ;;  %v842_v51 = vcombine.low %v810_v43, %v825_v46 }
 0x1f1   : > { %v1089_v23 = vrot.slane %v1082_v19, %v2920_v35  ;;  %v1097_v24 = vrot.slane %v2024_v20, %v2920_v35  ;;  %v1098_v31 = vcombine.low %v1073_v28, %v1081_v29  ;;  %v843_v52 = vcombine.high %v810_v43, %v825_v46  ;;  %v1565_v28 = vld [vmem:[#allocation7 + $0x10] sm:$0xff] }
 0x1f2   : > { %v787_v25 = vcombine.low %v778_v21, %v786_v22  ;;  %v788_v27 = vcombine.high %v778_v21, %v786_v22  ;;  %v834_v49 = vrot.slane %v826_v47, %v2924_v40  ;;  %v841_v50 = vrot.slane %v827_v48, %v2924_v40 }
 0x1f3   : > { %v1106_v30 = vcombine.low %v1089_v23, %v1097_v24  ;;  %v1105_v33 = vrot.slane %v1098_v31, %v2924_v40  ;;  %v850_v53 = vrot.slane %v842_v51, %v2924_v40  ;;  %v857_v26 = vrot.slane %v843_v52, %v2924_v40 }
 0x1f4   : > { %790 = vst.msk [vmem:[#allocation2] sm:$0xff] %vm789_vm2, %v787_v25  ;;  %791 = vst.msk [vmem:[#allocation2 + $0x8] sm:$0xff] %vm789_vm2, %v788_v27  ;;  %v862_v54 = vcombine.low %v834_v49, %v841_v50  ;;  %v2020_v55 = vcombine.high %v834_v49, %v841_v50  ;;  %v1563_v25 = vld [vmem:[#allocation7] sm:$0xff]  ;;  %v1564_v27 = vld [vmem:[#allocation7 + $0x8] sm:$0xff] }
 0x1f5   : > { %v1113_v32 = vrot.slane %v1106_v30, %v2924_v40  ;;  %v878_v58 = vcombine.low %v850_v53, %v857_v26  ;;  %v2021_v59 = vcombine.high %v850_v53, %v857_v26  ;;  %v2201_v29 = vpack.c.bf16 %v1564_v27, %v1563_v25  ;;  %v1566_v30 = vld [vmem:[#allocation7 + $0x18] sm:$0xff]  ;;  %v1758_v25 = vld [vmem:[%s3173_s18 + $0x10] sm:$0xff] }
 0x1f6   : > { %v869_v56 = vrot.slane %v862_v54, %v2920_v35  ;;  %v877_v57 = vrot.slane %v2020_v55, %v2920_v35  ;;  %v2204_v31 = vpack.c.bf16 %v1566_v30, %v1565_v28  ;;  %v1759_v28 = vld [vmem:[%s3173_s18 + $0x18] sm:$0xff]  ;;  %v1760_v30 = vld [vmem:[%s3173_s18 + $0x20] sm:$0xff] }
 0x1f7   : > { %v1114_v36 = vcombine.low %v1105_v33, %v1113_v32  ;;  %v1115_v38 = vcombine.high %v1105_v33, %v1113_v32  ;;  %v885_v60 = vrot.slane %v878_v58, %v2920_v35  ;;  %v893_v61 = vrot.slane %v2021_v59, %v2920_v35 }
 0x1f8   : > { %v894_v62 = vcombine.low %v869_v56, %v877_v57 }
 0x1f9   : > { %v902_v2 = vcombine.low %v885_v60, %v893_v61 }
 0x1fa   : > { %v901_v63 = vrot.slane %v894_v62, %v2924_v40 }
 0x1fb   : > { %v1116_v34 = vld [vmem:[#allocation2] sm:$0xff]  ;;  %v1117_v37 = vld [vmem:[#allocation2 + $0x8] sm:$0xff]  ;;  %v909_v3 = vrot.slane %v902_v2, %v2924_v40 }
 0x1fc   : > { %2122 = vmatpush3.xpose.msk.msra.mxu1 %vm789_vm2, %v1116_v34 }
 0x1fd   : > { %2126 = vmatprep.subr.mxu1 %v2552_v1  ;;  %v910_v4 = vcombine.low %v901_v63, %v909_v3  ;;  %v911_v5 = vcombine.high %v901_v63, %v909_v3 }
 0x1ff   : > { %2124 = vmatmul.mubr.msk.f32.vlgmr.msra.gmra.mrb[4].mxu1 %vm789_vm2, %v1114_v36  ;;  %912 = vst.msk [vmem:[#allocation3] sm:$0xff] %vm789_vm2, %v910_v4  ;;  %913 = vst.msk [vmem:[#allocation3 + $0x8] sm:$0xff] %vm789_vm2, %v911_v5 }
 0x200   : > { %2127 = vmatpush3.xpose.msk.msra.mxu1 %vm789_vm2, %v1117_v37  ;;  %2128 = vmatprep.mubr.msk.f32.mxu1 %vm2551_vm0, %v2552_v1 }
 0x201   : > { %2136 = vmatprep.subr.mxu1 %v2552_v1 }
 0x203   : > { %2129 = vmatmul.mubr.msk.f32.vlgmr.msra.gmra.mrb[6].mxu1 %vm789_vm2, %v1115_v38 }
 0x204   : > { %2138 = vmatprep.mubr.msk.f32.mxu1 %vm2551_vm0, %v2552_v1 }
 0x206   : > { %v1290_v6 = vld [vmem:[#allocation3] sm:$0xff]  ;;  %v1291_v7 = vld [vmem:[#allocation3 + $0x8] sm:$0xff] }
 0x207   : > { %2132 = vmatpush3.msra.mxu0 %v1290_v6  ;;  %2137 = vmatpush3.msra.mxu1 %v1291_v7 }
 0x208   : > { %2200 = vmatprep.subr.bf16.mxu0 %v2550_v0  ;;  %2206 = vmatprep.subr.bf16.mxu1 %v2550_v0 }
 0x2d2   : > { %v1191_v8 = vpop.f32.mrb[4].mxu1 }
 0x2d3   : > { %v2125_v9 = vpop.f32.mrb[5].mxu1  ;;  %v1272_v10 = vsel %vm1271_vm3, %v1191_v8, -inf }
 0x2d4   : > { %1273 = vmax.xlane.f32.xlu1 %v1272_v10 }
 0x2d6   : > { %v1267_v11 = vpop.f32.mrb[6].mxu1 }
 0x2d7   : > { %v2130_v12 = vpop.f32.mrb[7].mxu1  ;;  %v1275_v13 = vsel %vm1271_vm3, %v1267_v11, -inf }
 0x2d8   : > { %1276 = vmax.xlane.f32.xlu1 %v1275_v13 }
 0x361   : > { %v1274_v15 = vpop.xlane.xlu1 %1273 }
 0x362   : > { %v1278_v16 = vsub.f32 %v1191_v8, %v1274_v15 }
 0x364   : > { %v1280_v17 = vmul.f32 1.442695, %v1278_v16 }
 0x365   : > { %v1277_v18 = vpop.xlane.xlu1 %1276 }
 0x366   : > { %2326 = vpow2.f32 %v1280_v17  ;;  %v1279_v19 = vsub.f32 %v1267_v11, %v1277_v18 }
 0x368   : > { %v1282_v20 = vmul.f32 1.442695, %v1279_v19  ;;  %v1671_v19 = vld [vmem:[#allocation9] sm:$0xff] }
 0x36a   : > { %2328 = vpow2.f32 %v1282_v20  ;;  %v1672_v20 = vld [vmem:[#allocation9 + $0x8] sm:$0xff] }
 0x370   : > { %v2327_v21 = vpop.eup %2326 }
 0x371   : > { %2134 = vmatmul.mubr.msk.f32.vlgmr.msra.gmra.mrb[2].mxu0 %vm1271_vm3, %v2327_v21  ;;  %v1284_v22 = vsel %vm1271_vm3, %v2327_v21, 0.0  ;;  %v2207_v21 = vpack.c.bf16 %v1672_v20, %v1671_v19 }
 0x372   : > { %1285 = vadd.xlane.f32.xlu1 %v1284_v22  ;;  %2149 = vmatprep.mubr.msk.f32.mxu0 %vm2551_vm0, %v2552_v1  ;;  %v1673_v22 = vld [vmem:[#allocation9 + $0x10] sm:$0xff] }
 0x373   : > { %2202 = vmatpush3.bf16.msra.mxu0 %v2201_v29  ;;  %v2216_v29 = vpack.c.bf16 %v1759_v28, %v1758_v25 }
 0x374   : > { %v2329_v23 = vpop.eup %2328  ;;  %2203 = vmatprep.subr.bf16.mxu0 %v2550_v0 }
 0x375   : > { %2139 = vmatmul.mubr.msk.f32.vlgmr.msra.gmra.mrb[8].mxu1 %vm1271_vm3, %v2329_v23  ;;  %v1287_v24 = vsel %vm1271_vm3, %v2329_v23, 0.0  ;;  %v1756_v23 = vld [vmem:[%s3172_s28] sm:$0xff] }
 0x376   : > { %1288 = vadd.xlane.f32.xlu0 %v1287_v24  ;;  %2160 = vmatprep.mubr.msk.f32.mxu1 %vm2551_vm0, %v2552_v1  ;;  %v1757_v24 = vld [vmem:[%s3173_s18 + $0x8] sm:$0xff] }
 0x377   : > { %2205 = vmatpush3.bf16.msra.mxu0 %v2204_v31  ;;  %2208 = vmatpush3.bf16.msra.mxu1 %v2207_v21  ;;  %v2213_v27 = vpack.c.bf16 %v1757_v24, %v1756_v23  ;;  %v1761_v31 = vld [vmem:[%s3173_s18 + $0x28] sm:$0xff] }
 0x378   : > { %2212 = vmatprep.subr.bf16.mxu0 %v2550_v0  ;;  %2209 = vmatprep.subr.bf16.mxu1 %v2550_v0 }
 0x3ff   : > { %v1286_v32 = vpop.xlane.xlu1 %1285 }
 0x400   : > { %2330 = vrcp.f32 %v1286_v32  ;;  %v2219_v32 = vpack.c.bf16 %v1761_v31, %v1760_v30 }
 0x403   : > { %v1289_v33 = vpop.xlane.xlu0 %1288 }
 0x404   : > { %2332 = vrcp.f32 %v1289_v33 }
 0x40a   : > { %v2331_v34 = vpop.eup %2330 }
 0x40e   : > { %v2333_v39 = vpop.eup %2332 }
 0x444   : > { %v1361_v36 = vpop.f32.mrb[2].mxu0 }
 0x445   : > { %v1440_v37 = vmul.f32 %v2331_v34, %v1361_v36  ;;  %v2135_v38 = vpop.f32.mrb[3].mxu0 }
 0x446   : > { %v2034_v38 = vld [vmem:[%s3174_s15] ss:$0 sm:$0xff]  ;;  %s3178_s15 = sld [smem:[#allocation24_spill]] }
 0x447   : > { %v1442_v42 = vcombine.high %v1440_v37, %v2552_v1  ;;  %v1449_v45 = vrot.slane %v1440_v37, %v2920_v35 }
 0x448   : > { %v1434_v41 = vpop.f32.mrb[8].mxu1 }
 0x449   : > { %v1441_v43 = vmul.f32 %v2333_v39, %v1434_v41  ;;  %v2140_v44 = vpop.f32.mrb[9].mxu1  ;;  %v1456_v48 = vrot.slane %v1442_v42, %v2920_v35  ;;  %v2035_v41 = vld [vmem:[%s3175_s9] ss:$0 sm:$0xff]  ;;  %s3179_s9 = sld [smem:[#allocation25_spill]] }
 0x44a   : > { %v1763_v44 = vld [vmem:[%s3173_s18 + $0x38] sm:$0xff] }
 0x44b   : > { %v1457_v46 = vcombine.high %v1441_v43, %v2552_v1  ;;  %v1464_v47 = vrot.slane %v1441_v43, %v2920_v35 }
 0x44d   : > { %v1471_v49 = vrot.slane %v1457_v46, %v2920_v35  ;;  %v1472_v50 = vcombine.low %v1449_v45, %v1464_v47  ;;  %v1473_v51 = vcombine.high %v1449_v45, %v1464_v47  ;;  %v2036_v46 = vld [vmem:[#allocation10] ss:$0 sm:$0xff] }
 0x44f   : > { %v1480_v52 = vrot.slane %v1472_v50, %v2924_v40  ;;  %v1487_v53 = vrot.slane %v1473_v51, %v2924_v40  ;;  %v1488_v26 = vcombine.low %v1456_v48, %v1471_v49  ;;  %v1489_v54 = vcombine.high %v1456_v48, %v1471_v49  ;;  %v2038_v51 = vld [vmem:[%s3176_s10] ss:$0 sm:$0xff]  ;;  %s3077_s10 = scalar_lea.hbm %s3180_s19, %s2043_s17 }
 0x451   : > { %v1496_v55 = vrot.slane %v1488_v26, %v2924_v40  ;;  %v1503_v56 = vrot.slane %v1489_v54, %v2924_v40  ;;  %v1508_v57 = vcombine.low %v1480_v52, %v1487_v53  ;;  %v2031_v58 = vcombine.high %v1480_v52, %v1487_v53 }
 0x453   : > { %v1524_v59 = vcombine.low %v1496_v55, %v1503_v56  ;;  %v2032_v60 = vcombine.high %v1496_v55, %v1503_v56  ;;  %v1515_v61 = vrot.slane %v1508_v57, %v2920_v35  ;;  %v1523_v62 = vrot.slane %v2031_v58, %v2920_v35 }
 0x455   : > { %v1531_v63 = vrot.slane %v1524_v59, %v2920_v35  ;;  %v1539_v2 = vrot.slane %v2032_v60, %v2920_v35  ;;  %v1540_v3 = vcombine.low %v1515_v61, %v1523_v62 }
 0x457   : > { %v1548_v4 = vcombine.low %v1531_v63, %v1539_v2  ;;  %v1547_v5 = vrot.slane %v1540_v3, %v2924_v40  ;;  %v2040_v3 = vld [vmem:[%s3178_s15] ss:$0 sm:$0xff]  ;;  %s2458_s15 = scalar_lea.vmem %s2457_s6, 256 }
 0x458   : > { %p2460_p7 = scmp.lt.s32.totalorder %s2458_s15, %s2452_s24 }
 0x459   : > { %v1555_v6 = vrot.slane %v1548_v4, %v2924_v40 }
 0x45a   : > { %p2461_p9 = por %p2460_p7, %p2459_p5 }
 0x45b   : > { %v1557_v7 = vcombine.high %v1547_v5, %v1555_v6  ;;  %v1556_v8 = vcombine.low %v1547_v5, %v1555_v6  ;;  %v2041_v5 = vld [vmem:[%s3179_s9] ss:$0 sm:$0xff] }
 0x45c   : > { %p2462_p0 = pnand %p2461_p9, %p2455_p3 }
 0x45d   : > { %1559 = vrot.lane.b32.xlu1 %v1557_v7, %s2556_s21  ;;  %s1877_s21 = scalar_lea.sflag [#allocation6], %s2834_s12 }
 0x4cf   : > { %v1560_v9 = vpop.permute.xlu1 %1559 }
 0x4d0   : > { %v1562_v10 = vsel %vm789_vm2, %v1556_v8, %v1560_v9 }
 0x4d1   : > { %2150 = vmatmul.mubr.msk.f32.vlgmr.msra.gmra.mrb[4].mxu0 %vm521_vm1, %v1562_v10 }
 0x4d2   : > { %2179 = vmatprep.mubr.msk.f32.mxu0 %vm2551_vm0, %v2552_v1  ;;  %v1674_v1 = vld [vmem:[#allocation9 + $0x18] sm:$0xff]  ;;  %2214 = vmatpush3.bf16.msra.mxu0 %v2213_v27 }
 0x4d3   : > { %2215 = vmatprep.subr.bf16.mxu0 %v2550_v0 }
 0x4d6   : > { %2217 = vmatpush3.bf16.msra.mxu0 %v2216_v29 }
 0x4d7   : > { %2218 = vmatprep.subr.bf16.mxu0 %v2550_v0 }
 0x4da   : > { %2220 = vmatpush3.bf16.msra.mxu0 %v2219_v32 }
 0x4db   : > { %2221 = vmatprep.subr.bf16.mxu0 %v2550_v0  ;;  %v1762_v0 = vld [vmem:[%s3173_s18 + $0x30] sm:$0xff] }
 0x4dc   : > { %v2222_v45 = vpack.c.bf16 %v1763_v44, %v1762_v0 }
 0x4de   : > { %2223 = vmatpush3.bf16.msra.mxu0 %v2222_v45 }
 0x5a4   : > { %v1636_v11 = vpop.f32.mrb[4].mxu0 }
 0x5a5   : > { %v1640_v35 = vadd.f32 %v1636_v11, %v2887_v14  ;;  %v2151_v12 = vpop.f32.mrb[5].mxu0  ;;  %v2210_v14 = vpack.c.bf16 %v1674_v1, %v1673_v22 }
 0x5a7   : > { %v1643_v13 = vsel %vm521_vm1, %v1640_v35, 0.0  ;;  %2211 = vmatpush3.bf16.msra.mxu1 %v2210_v14 }
 0x5a8   : > { %1644 = vadd.xlane.f32.xlu1 %v1643_v13 }
 0x635   : > { %v1645_v40 = vpop.xlane.xlu1 %1644 }
 0x636   : > { %v1647_v15 = vmul.f32 0.03125, %v1645_v40 }
 0x638   : > { %v1648_v16 = vsub.f32 %v1640_v35, %v1647_v15 }
 0x63a   : > { %v1649_v17 = vmul.f32 %v1648_v16, %v1648_v16 }
 0x63c   : > { %v1650_v18 = vsel %vm521_vm1, %v1649_v17, 0.0 }
 0x63d   : > { %1651 = vadd.xlane.f32.xlu0 %v1650_v18 }
 0x6ca   : > { %v1652_v33 = vpop.xlane.xlu0 %1651 }
 0x6cb   : > { %v1653_v34 = vmul.f32 0.03125, %v1652_v33 }
 0x6cd   : > { %v1654_v36 = vadd.f32 1e-05, %v1653_v34 }
 0x6cf   : > { %2334 = vrsqrt.f32 %v1654_v36 }
 0x6d9   : > { %v2335_v37 = vpop.eup %2334 }
 0x6da   : > { %v1656_v39 = vmul.f32 %v2335_v37, %v1648_v16 }
 0x6dc   : > { %v1663_v42 = vmul.f32 %v2034_v38, %v1656_v39 }
 0x6de   : > { %v1670_v43 = vadd.f32 %v2035_v41, %v1663_v42 }
 0x6e0   : > { %2161 = vmatmul.mubr.msk.f32.vlgmr.msra.gmra.mrb[10].mxu1 %vm521_vm1, %v1670_v43 }
 0x7b3   : > { %v1751_v47 = vpop.f32.mrb[10].mxu1 }
 0x7b4   : > { %v1752_v48 = vadd.f32 %v2036_v46, %v1751_v47  ;;  %v2162_v49 = vpop.f32.mrb[11].mxu1 }
 0x7b6   : > { %v1755_v50 = vmax.f32 %v1752_v48, 0.0 }
 0x7b8   : > { %2180 = vmatmul.mubr.msk.f32.vlgmr.msra.gmra.mrb[6].mxu0 %vm1771_vm4, %v1755_v50 }
 0x88b   : > { %v1841_v52 = vpop.f32.mrb[6].mxu0 }
 0x88c   : > { %v1842_v53 = vadd.f32 %v2038_v51, %v1841_v52  ;;  %v2181_v26 = vpop.f32.mrb[7].mxu0 }
 0x88e   : > { %v1845_v54 = vadd.f32 %v1842_v53, %v1670_v43 }
 0x890   : > { %v1848_v55 = vsel %vm521_vm1, %v1845_v54, 0.0 }
 0x891   : > { %1849 = vadd.xlane.f32.xlu0 %v1848_v55 }
 0x91e   : > { %v1850_v56 = vpop.xlane.xlu0 %1849 }
 0x91f   : > { %v1851_v57 = vmul.f32 0.03125, %v1850_v56 }
 0x921   : > { %v1852_v58 = vsub.f32 %v1845_v54, %v1851_v57 }
 0x923   : > { %v1853_v59 = vmul.f32 %v1852_v58, %v1852_v58 }
 0x925   : > { %v1854_v60 = vsel %vm521_vm1, %v1853_v59, 0.0 }
 0x926   : > { %1855 = vadd.xlane.f32.xlu0 %v1854_v60 }
 0x9b3   : > { %v1856_v61 = vpop.xlane.xlu0 %1855 }
 0x9b4   : > { %v1857_v62 = vmul.f32 0.03125, %v1856_v61 }
 0x9b6   : > { %v1858_v63 = vadd.f32 1e-05, %v1857_v62 }
 0x9b8   : > { %2336 = vrsqrt.f32 %v1858_v63 }
 0x9c2   : > { %v2337_v2 = vpop.eup %2336 }
 0x9c3   : > { %v1860_v4 = vmul.f32 %v2337_v2, %v1852_v58 }
 0x9c5   : > { %v1867_v6 = vmul.f32 %v2040_v3, %v1860_v4 }
 0x9c7   : > { %v1874_v7 = vadd.f32 %v2041_v5, %v1867_v6 }
 0x9c9   : > { %1875 = vst.msk [vmem:[%s511_s16] sm:$0xff] %vm521_vm1, %v1874_v7 }
 0x9ca   : > { %2465 = shalt.err (!%p2462_p0)
}
 0x9cb   : > { %s2466_s12 = scalar_lea.hbm %s3077_s10, 128  ;;  %s2470_s9 = scalar_lea.hbm %s3180_s19, 256 }
 0x9cc   : > { %p2467_p4 = scmp.ne.s32.totalorder %s3077_s10, %s2466_s12  ;;  %p2471_p1 = scmp.lt.u32.totalorder %s3077_s10, %s3180_s19 }
 0x9cd   : > { %p2472_p12 = scmp.lt.u32.totalorder %s2470_s9, %s2466_s12  ;;  %p2474_p13 = scmp.lt.u32.totalorder %s2466_s12, %s3077_s10 }
 0x9ce   : > { %p2468_p2 = pnand %p2467_p4, %p2779_p10 }
 0x9cf   : > { %p2473_p11 = por %p2472_p12, %p2471_p1 }
 0x9d0   : > { %p2469_p8 = pneg %p2468_p2 }
 0x9d1   : > { %p2475_p6 = por %p2474_p13, %p2473_p11 }
 0x9d3   : > { %p2476_p3 = pnand %p2475_p6, %p2469_p8 }
 0x9d5   : > { %2479 = shalt.err (!%p2476_p3)
}
 0x9d6   : > { %2238 = dma.vmem_to_hbm [thread:$0]  (%p2779_p10), %s3079_s11, 128, %s3077_s10, %s1877_s21  }
 0x9d7 PF: > { %s3181_s22 = sld [smem:[#allocation17_spill]]  ;;  %s3182_s14 = sld [smem:[#allocation19_spill]] }
 0x9d8   : > { %p3184_p7 = scmp.ge.s32.totalorder %s2542_s30, 2 }
 0x9dd   : > { %s1903_s24 = sand.u32 1, %s3181_s22   ;;  %p3183_p5 = scmp.ne.s32.totalorder %s3182_s14, 0 }
 0x9de   : > { %s1904_s13 = scalar_lea.sflag [#allocation6], %s1903_s24 }
 0x9df   : > { %p2255_p9 = pnand %p3184_p7, %p3183_p5 }
 0x9e1   : > { %2517 = dma.done.wait (!%p2255_p9), %s1904_s13, 128  }
 0x9e2   : > { %2519 = vsyncadd (!%p2255_p9), %s1904_s13, 4294967168  ;;  %s31_s30 = sadd.s32 1, %s2542_s30   ;;  %s3185_s23 = smov %s2791_s25 }
 0x9e3   : > { %p28_p0 = scmp.ge.s32.totalorder %s31_s30, 4   ;;  %s3186_s25 = smov %s2526_s26 }
 0x9e4   : > { %s3187_s26 = smov %s2530_s27  ;;  %s3188_s27 = smov %s3185_s23 }
 0x9e5   : > { %s3189_s28 = smov %s2538_s29  ;;  %s3190_s29 = smov %s3192_s5 }
 0x9e6   :  { %30 = sbr.rel (!%p28_p0) target bundleno = 16 (0x10), region = 134 }
 0x9ed   :  { %1909 = vsyncpa [#allocation5], 1 }
 0x9ee   :  { %1911 = vsyncpa [#allocation5 + $0x1], 1 }
 0x9ef   :  { %1912 = vsyncpa [#allocation8], 1 }
 0x9f0   :  { %1913 = vsyncpa [#allocation11], 1 }
 0x9f1   :  { %1914 = vsyncpa [#allocation6], 1 }
 0x9f2   :  { %1916 = vsyncpa [#allocation6 + $0x1], 1 }

// kernel: tpu_custom_call.1
= control target key start
LH: loop header
LB: loop body
LE: loop exit
PB: predicated region body
PF: predicated region fallthrough
CT: control target
= control target key end

     0   :  { %s3127_s0 = inlined_call_operand.hbm [shape: f32[2,8,32], index: 0, kind: input, shape index: {}]   ;;  %s3128_s1 = inlined_call_operand.vmem [shape: f32[32,32], index: 1, kind: input, shape index: {}]   ;;  %s3129_s2 = inlined_call_operand.vmem [shape: f32[32,32], index: 2, kind: input, shape index: {}]   ;;  %s3130_s3 = inlined_call_operand.vmem [shape: f32[32,32], index: 3, kind: input, shape index: {}]   ;;  %s3131_s4 = inlined_call_operand.hbm [shape: f32[32,32], index: 4, kind: input, shape index: {}]   ;;  %s3132_s5 = inlined_call_operand.vmem [shape: f32[1,32], index: 5, kind: input, shape index: {}]   ;;  %s3133_s6 = inlined_call_operand.vmem [shape: f32[1,32], index: 6, kind: input, shape index: {}]   ;;  %s3134_s7 = inlined_call_operand.hbm [shape: f32[32,64], index: 7, kind: input, shape index: {}]   ;;  %s3135_s8 = inlined_call_operand.hbm [shape: f32[1,64], index: 8, kind: input, shape index: {}]   ;;  %s3136_s9 = inlined_call_operand.vmem [shape: f32[64,32], index: 9, kind: input, shape index: {}]   ;;  %s3137_s10 = inlined_call_operand.vmem [shape: f32[1,32], index: 10, kind: input, shape index: {}]   ;;  %s3138_s11 = inlined_call_operand.vmem [shape: f32[1,32], index: 11, kind: input, shape index: {}]   ;;  %s3139_s12 = inlined_call_operand.vmem [shape: f32[1,32], index: 12, kind: input, shape index: {}]   ;;  %s3140_s13 = inlined_call_operand.hbm [shape: f32[2,8,32], index: 13, kind: output, shape index: {}]  }
   0x1   :  { %3149 = sst [smem:[#allocation20_spill]] %s3132_s5 }
   0x2   :  { %3150 = sst [smem:[#allocation21_spill]] %s3133_s6 }
   0x3   :  { %3151 = sst [smem:[#allocation22_spill]] %s3136_s9 }
   0x4   :  { %3152 = sst [smem:[#allocation23_spill]] %s3137_s10 }
   0x5   :  { %3153 = sst [smem:[#allocation24_spill]] %s3138_s11 }
   0x6   :  { %3154 = sst [smem:[#allocation25_spill]] %s3139_s12 }
   0x7   :  { %3155 = sst [smem:[#allocation26_spill]] %s3140_s13 }
   0x8   :  { %18 = vsyncpa [#allocation5], 0 }
   0x9   :  { %20 = vsyncpa [#allocation5 + $0x1], 0 }
   0xa   :  { %21 = vsyncpa [#allocation8], 0 }
   0xb   :  { %22 = vsyncpa [#allocation11], 0 }
   0xc   :  { %23 = vsyncpa [#allocation6], 0 }
   0xd   :  { %25 = vsyncpa [#allocation6 + $0x1], 0  ;;  %s2628_s25 = smov 0   ;;  %s2630_s26 = smov 0  }
   0xe   :  { %s2632_s27 = smov 0   ;;  %s2634_s28 = smov 0  }
   0xf   :  { %s2636_s29 = smov 0   ;;  %s2638_s30 = smov 0  }
  0x10 LB: > { %3156 = sst [smem:[#allocation17_spill]] %s2522_s25  ;;  %s2001_s14 = sadd.s32 4294967295, %s2542_s30   ;;  %s2542_s30 = sphi %s2638_s30, %s31_s30   ;;  %s2538_s29 = sphi %s2636_s29, %s3190_s29   ;;  %s2534_s28 = sphi %s2634_s28, %s3189_s28   ;;  %s2530_s27 = sphi %s2632_s27, %s3188_s27   ;;  %s2526_s26 = sphi %s2630_s26, %s3187_s26   ;;  %s2522_s25 = sphi %s2628_s25, %s3186_s25  }
  0x11   : > { %3157 = sst [smem:[#allocation18_spill]] %s2534_s28  ;;  %s2002_s15 = sadd.s32 4294967294, %s2542_s30  }
  0x12   : > { %p63_p0 = scmp.ne.s32.totalorder %s2526_s26, %s2522_s25  ;;  %p2662_p1 = scmp.eq.s32.totalorder %s2001_s14, 0 }
  0x13   : > { %p2666_p2 = scmp.eq.s32.totalorder %s2001_s14, 1  ;;  %p347_p3 = scmp.eq.s32.totalorder %s2002_s15, 1 }
  0x14   : > { %s3158_s16 = scalar_select %p2662_p1, 1, 0 }
  0x15   : > { %s3159_s17 = scalar_select %p2666_p2, 1, 0 }
  0x16   : > { %p2672_p4 = por %p2662_p1, %p63_p0  ;;  %p2003_p5 = scmp.ge.s32.totalorder %s2542_s30, 1 }
  0x17   : > { %p2677_p6 = por %p347_p3, %p63_p0  ;;  %p354_p7 = scmp.lt.s32.totalorder %s2542_s30, 3 }
  0x18   : > { %s3160_s18 = scalar_select %p2672_p4, 1, 0 }
  0x19   : > { %s3161_s19 = scalar_select %p2677_p6, 1, 0 }
  0x1a   : > { %p2682_p8 = pnand %p2003_p5, %p354_p7  ;;  %s2544_s21 = smov [#allocation7]  }
  0x1b   : > { %3162 = sst [smem:[#allocation19_spill]] %s3161_s19  ;;  %s375_s22 = sshll.u32 %s2544_s21, 4  ;;  %s2686_s22 = int_to_ptr.vmem [resolvable:$true] %s375_s22 }
  0x1c   : > { %s3163_s20 = scalar_select %p2682_p8, 1, 0 }
  0x1d   : > { %p2240_p9 = pneg %p2682_p8  ;;  %s2545_s24 = smov [#allocation9]  }
  0x1e   : > { %s394_s14 = sshll.u32 %s2545_s24, 4  ;;  %s2546_s15 = smov [#allocation10]   ;;  %s2697_s14 = int_to_ptr.vmem [resolvable:$true] %s394_s14 }
  0x1f   : > { %p2693_p11 = pnand %p2240_p9, %p2662_p1  ;;  %s2699_s19 = sshll.u32 %s2546_s15, 4  ;;  %s409_s19 = int_to_ptr.vmem [resolvable:$true] %s2699_s19 }
  0x20   : > { %s2338_s13 = scalar_lea.hbm %s3131_s4, 512 }
  0x21   : > { %p2339_p12 = scmp.ne.s32.totalorder %s3131_s4, %s2338_s13  ;;  %p2709_p13 = pneg %p2693_p11 }
  0x22   : > { %p2345_p5 = scmp.lt.u32.totalorder %s2338_s13, %s3131_s4 }
  0x23   : > { %p2341_p0 = pnand %p2709_p13, %p2339_p12 }
  0x25   : > { %p2342_p3 = pneg %p2341_p0 }
  0x27   : > { %p2347_p7 = pnand %p2345_p5, %p2342_p3 }
  0x29   : > { %2350 = shalt.err (!%p2347_p7)
}
  0x2a   : > { %s2351_s11 = scalar_lea.vmem %s2686_s22, 512  ;;  %p2359_p1 = scmp.lt.s32.totalorder %s2686_s22, %s2686_s22 }
  0x2b   : > { %p2352_p9 = scmp.ne.s32.totalorder %s2686_s22, %s2351_s11  ;;  %p2360_p4 = scmp.lt.s32.totalorder %s2351_s11, %s2351_s11 }
  0x2d   : > { %p2354_p10 = pnand %p2352_p9, %p2709_p13  ;;  %p2361_p12 = por %p2360_p4, %p2359_p1 }
  0x2f   : > { %p2355_p6 = pneg %p2354_p10 }
  0x31   : > { %p2362_p0 = pnand %p2361_p12, %p2355_p6 }
  0x33   : > { %2365 = shalt.err (!%p2362_p0)
}
  0x34   : > { %s2547_s12 = smov 128   ;;  %s2548_s13 = smov 8  }
  0x35   : > { %2243 = dma.hbm_to_vmem [thread:$0]  (!%p2693_p11), %s3131_s4, 512, %s2686_s22, [#allocation8], %s2547_s12, %s2547_s12, %s2548_s13  }
  0x36   : > { %s2366_s10 = scalar_lea.hbm %s3134_s7, 512 }
  0x37   : > { %p2367_p1 = scmp.ne.s32.totalorder %s3134_s7, %s2366_s10  ;;  %p2373_p10 = scmp.lt.u32.totalorder %s2366_s10, %s3134_s7 }
  0x39   : > { %p2369_p4 = pnand %p2367_p1, %p2709_p13 }
  0x3b   : > { %p2370_p6 = pneg %p2369_p4 }
  0x3d   : > { %p2375_p3 = pnand %p2373_p10, %p2370_p6 }
  0x3f   : > { %2378 = shalt.err (!%p2375_p3)
}
  0x40   : > { %s2379_s22 = scalar_lea.vmem %s2697_s14, 512  ;;  %p2387_p12 = scmp.lt.s32.totalorder %s2697_s14, %s2697_s14 }
  0x41   : > { %p2380_p5 = scmp.ne.s32.totalorder %s2697_s14, %s2379_s22  ;;  %p2388_p0 = scmp.lt.s32.totalorder %s2379_s22, %s2379_s22 }
  0x43   : > { %p2382_p7 = pnand %p2380_p5, %p2709_p13  ;;  %p2389_p1 = por %p2388_p0, %p2387_p12 }
  0x45   : > { %p2383_p9 = pneg %p2382_p7 }
  0x47   : > { %p2390_p4 = pnand %p2389_p1, %p2383_p9 }
  0x49   : > { %2393 = shalt.err (!%p2390_p4)
}
  0x4a   : > { %2246 = dma.hbm_to_vmem [thread:$0]  (!%p2693_p11), %s3134_s7, 512, %s2697_s14, [#allocation8], %s2547_s12, %s2547_s12, %s2548_s13  }
  0x4b   : > { %s2394_s25 = scalar_lea.hbm %s3135_s8, 16 }
  0x4c   : > { %p2395_p6 = scmp.ne.s32.totalorder %s3135_s8, %s2394_s25  ;;  %p2401_p5 = scmp.lt.u32.totalorder %s2394_s25, %s3135_s8 }
  0x4e   : > { %p2397_p10 = pnand %p2395_p6, %p2709_p13 }
  0x50   : > { %p2398_p3 = pneg %p2397_p10 }
  0x52   : > { %p2403_p7 = pnand %p2401_p5, %p2398_p3 }
  0x54   : > { %2406 = shalt.err (!%p2403_p7)
}
  0x55   : > { %s2407_s22 = scalar_lea.vmem %s409_s19, 16  ;;  %s2414_s14 = scalar_lea.vmem %s409_s19, 32 }
  0x56   : > { %p2408_p9 = scmp.ne.s32.totalorder %s409_s19, %s2407_s22  ;;  %p2415_p1 = scmp.lt.s32.totalorder %s409_s19, %s409_s19 }
  0x57   : > { %p2416_p4 = scmp.lt.s32.totalorder %s2414_s14, %s2407_s22 }
  0x58   : > { %p2410_p12 = pnand %p2408_p9, %p2709_p13 }
  0x59   : > { %p2417_p8 = por %p2416_p4, %p2415_p1 }
  0x5a   : > { %p2411_p0 = pneg %p2410_p12 }
  0x5c   : > { %p2418_p2 = pnand %p2417_p8, %p2411_p0 }
  0x5e   : > { %2421 = shalt.err (!%p2418_p2)
}
  0x5f   : > { %2249 = dma.hbm_to_vmem [thread:$0]  (!%p2693_p11), %s3135_s8, 16, %s409_s19, [#allocation11]  }
  0x60   : > { %s50_s28 = sadd.s32 1, %s2530_s27  ;;  %s43_s5 = sadd.s32 1, %s2538_s29 }
  0x61   : > { %p57_p2 = scmp.ne.s32.totalorder %s2530_s27, %s2526_s26  ;;  %p45_p8 = scmp.ge.s32.totalorder %s43_s5, 2 }
  0x62   : > { %p58_p13 = scmp.eq.s32.totalorder %s2542_s30, 0  ;;  %p3166_p6 = scmp.ne.s32.totalorder %s3159_s17, 0 }
  0x63   : > { %p2261_p3 = scmp.lt.s32.totalorder %s2542_s30, 2  ;;  %s3192_s5 = smov (%p45_p8, %s43_s5), 0 }
  0x64   : > { %p2779_p10 = por %p3166_p6, %p57_p2  ;;  %p59_p5 = por %p58_p13, %p57_p2 }
  0x65   : > { %s431_s6 = sand.u32 1, %s2530_s27   ;;  %s47_s9 = ssub.s32 %s2538_s29, %s3192_s5 }
  0x66   : > { %p48_p7 = scmp.eq.s32.totalorder %s47_s9, 0  ;;  %s2008_s19 = sshll.u32 %s431_s6, 3 }
  0x67   : > { %s2009_s10 = sshll.u32 %s2538_s29, 7  ;;  %s435_s15 = scalar_lea.vmem [#allocation4], %s2008_s19 }
  0x68   : > { %s2791_s25 = scalar_select %p48_p7, %s2530_s27, %s50_s28  }
  0x69   : > { %s2796_s17 = scalar_lea.hbm %s3127_s0, %s2009_s10  ;;  %s442_s11 = sshll.u32 %s435_s15, 4  ;;  %s2798_s11 = int_to_ptr.vmem [resolvable:$true] %s442_s11 }
  0x6a   : > { %p2802_p11 = pnand %p2261_p3, %p59_p5  ;;  %s432_s14 = scalar_lea.sflag [#allocation5], %s431_s6 }
  0x6b   : > { %s2422_s12 = scalar_lea.hbm %s2796_s17, 128  ;;  %s2427_s9 = scalar_lea.hbm %s3127_s0, 256 }
  0x6c   : > { %p2423_p9 = scmp.ne.s32.totalorder %s2796_s17, %s2422_s12  ;;  %p2424_p12 = pneg %p2802_p11 }
  0x6d   : > { %p2428_p4 = scmp.lt.u32.totalorder %s2796_s17, %s3127_s0  ;;  %p2429_p2 = scmp.lt.u32.totalorder %s2427_s9, %s2422_s12 }
  0x6e   : > { %p2425_p0 = pnand %p2424_p12, %p2423_p9  ;;  %p2431_p13 = scmp.lt.u32.totalorder %s2422_s12, %s2796_s17 }
  0x6f   : > { %p2430_p8 = por %p2429_p2, %p2428_p4 }
  0x70   : > { %p2426_p1 = pneg %p2425_p0 }
  0x71   : > { %p2432_p6 = por %p2431_p13, %p2430_p8 }
  0x73   : > { %p2433_p3 = pnand %p2432_p6, %p2426_p1 }
  0x75   : > { %2436 = shalt.err (!%p2433_p3)
}
  0x76   : > { %s2437_s6 = scalar_lea.vmem %s2798_s11, 128  ;;  %s2549_s21 = smov [#allocation4]  }
  0x77   : > { %p2438_p5 = scmp.ne.s32.totalorder %s2798_s11, %s2437_s6  ;;  %s2442_s24 = sshll.u32 %s2549_s21, 4  ;;  %s2443_s24 = int_to_ptr.vmem [resolvable:$false] %s2442_s24 }
  0x78   : > { %s2444_s15 = scalar_lea.vmem %s2443_s24, 256  ;;  %p2445_p0 = scmp.lt.s32.totalorder %s2798_s11, %s2443_s24 }
  0x79   : > { %p2440_p7 = pnand %p2438_p5, %p2424_p12  ;;  %p2446_p4 = scmp.lt.s32.totalorder %s2444_s15, %s2437_s6 }
  0x7b   : > { %p2441_p9 = pneg %p2440_p7  ;;  %p2447_p2 = por %p2446_p4, %p2445_p0 }
  0x7d   : > { %p2448_p8 = pnand %p2447_p2, %p2441_p9 }
  0x7f   : > { %2451 = shalt.err (!%p2448_p8)
}
  0x80   : > { %2253 = dma.hbm_to_vmem [thread:$0]  (!%p2802_p11), %s2796_s17, 128, %s2798_s11, %s432_s14  }
  0x81   : > { %p3169_p1 = scmp.ne.s32.totalorder %s3163_s20, 0 }
  0x82   : > { %s2834_s12 = sand.u32 (!%p3169_p1), 1, %s2526_s26   ;;  %p3170_p12 = scmp.ne.s32.totalorder (!%p3169_p1), %s3160_s18, 0 }
  0x83   : > { %451 = sbr.rel (%p3169_p1) target bundleno = 2519 (0x9d7), region = 72  ;;  %s2011_s13 = sshll.u32 (!%p3169_p1), %s2834_s12, 3 }
  0x84   : > { %s454_s28 = scalar_lea.sflag (!%p3169_p1), [#allocation5], %s2834_s12  ;;  %s2840_s9 = scalar_lea.vmem (!%p3169_p1), [#allocation4], %s2011_s13 }
  0x8a   : > { %2505 = dma.done.wait (%p3170_p12), %s454_s28, 128  }
  0x8b   : > { %2507 = vsyncadd (%p3170_p12), %s454_s28, 4294967168  ;;  %p3171_p11 = scmp.ne.s32.totalorder %s3158_s16, 0 }
  0x8d   : > { %2509 = dma.done.wait (%p3171_p11), [#allocation8], 1024  }
  0x8e   : > { %2511 = vsyncadd (%p3171_p11), [#allocation8], 4294966272 }
  0x8f   : > { %2513 = dma.done.wait (%p3171_p11), [#allocation11], 16  }
  0x90   : > { %2515 = vsyncadd (%p3171_p11), [#allocation11], 4294967280  ;;  %v2550_v0 = vmov 0.0|0.0   ;;  %vm2551_vm0 = vmmov 0   ;;  %v2552_v1 = vmov 0.0   ;;  %v517_v2 = vld [vmem:[%s3129_s2] sm:$0xff]  ;;  %v677_v30 = vlaneseq }
  0x91   : > { %2182 = vmatprep.subr.bf16.mxu1 %v2550_v0  ;;  %2194 = vmatprep.subr.bf16.mxu0 %v2550_v0  ;;  %v518_v3 = vld [vmem:[%s3129_s2 + $0x8] sm:$0xff]  ;;  %v917_v4 = vld [vmem:[%s3128_s1] sm:$0xff]  ;;  %v519_v7 = vld [vmem:[%s3129_s2 + $0x10] sm:$0xff]  ;;  %vm521_vm1 = vcmask 261120   ;;  %s2553_s6 = smov 112   ;;  %vm789_vm2 = vcmask 130048  }
  0x92   : > { %2096 = vmatprep.mubr.msk.f32.mxu1 %vm2551_vm0, %v2552_v1  ;;  %2118 = vmatprep.mubr.msk.f32.mxu0 %vm2551_vm0, %v2552_v1  ;;  %v2183_v5 = vpack.c.bf16 %v518_v3, %v517_v2  ;;  %v918_v6 = vld [vmem:[%s3128_s1 + $0x8] sm:$0xff]  ;;  %v520_v8 = vld [vmem:[%s3129_s2 + $0x18] sm:$0xff]  ;;  %v919_v10 = vld [vmem:[%s3128_s1 + $0x10] sm:$0xff]  ;;  %v2554_v28 = vmov 1983009808   ;;  %v678_v32 = vshrl.u32 %v677_v30, 7 }
  0x93   : > { %v2195_v9 = vpack.c.bf16 %v918_v6, %v917_v4  ;;  %v920_v11 = vld [vmem:[%s3128_s1 + $0x18] sm:$0xff]  ;;  %v2186_v12 = vpack.c.bf16 %v520_v8, %v519_v7  ;;  %v2887_v14 = vld [vmem:[%s2840_s9] sm:$0xff]  ;;  %v597_v17 = vld [vmem:[%s3130_s3 + $0x10] sm:$0xff]  ;;  %v675_v29 = vunpack.c.l.s4 %v2554_v28  ;;  %v2555_v33 = vmov 1934713408   ;;  %s2556_s21 = smov 16  }
  0x94   : > { %2184 = vmatpush3.bf16.msra.mxu1 %v2183_v5  ;;  %v2198_v13 = vpack.c.bf16 %v920_v11, %v919_v10  ;;  %v595_v15 = vld [vmem:[%s3130_s3] sm:$0xff]  ;;  %v596_v16 = vld [vmem:[%s3130_s3 + $0x8] sm:$0xff]  ;;  %v598_v19 = vld [vmem:[%s3130_s3 + $0x18] sm:$0xff]  ;;  %v706_v34 = vunpack.c.l.s4 %v2555_v33  ;;  %vm1271_vm3 = vcmask 64512   ;;  %s3172_s28 = sld [smem:[#allocation22_spill]]  ;;  %s3174_s15 = sld [smem:[#allocation20_spill]] }
  0x95   : > { %2196 = vmatpush3.bf16.msra.mxu0 %v2195_v9  ;;  %2185 = vmatprep.subr.bf16.mxu1 %v2550_v0  ;;  %v2189_v18 = vpack.c.bf16 %v596_v16, %v595_v15  ;;  %v2192_v20 = vpack.c.bf16 %v598_v19, %v597_v17  ;;  %v676_v31 = vunpack.c.0.s8 %v675_v29  ;;  %s3175_s9 = sld [smem:[#allocation21_spill]]  ;;  %vm1771_vm4 = vcmask 523264   ;;  %s3176_s10 = sld [smem:[#allocation23_spill]] }
  0x96   : > { %2197 = vmatprep.subr.bf16.mxu0 %v2550_v0  ;;  %v707_v36 = vunpack.c.0.s8 %v706_v34  ;;  %s511_s16 = scalar_lea.vmem [#allocation12], %s2011_s13  ;;  %s3180_s19 = sld [smem:[#allocation26_spill]] }
  0x97   : > { %v2920_v35 = vsub.s32 %v676_v31, %v678_v32  ;;  %s1891_s11 = sshll.u32 %s511_s16, 4  ;;  %s2557_s13 = smov [#allocation12]   ;;  %s3079_s11 = int_to_ptr.vmem [resolvable:$true] %s1891_s11 }
  0x98   : > { %2187 = vmatpush3.bf16.msra.mxu1 %v2186_v12  ;;  %v2924_v40 = vsub.s32 %v707_v36, %v678_v32  ;;  %s2452_s24 = scalar_lea.vmem %s3079_s11, 128 }
  0x99   : > { %2199 = vmatpush3.bf16.msra.mxu0 %v2198_v13  ;;  %2188 = vmatprep.subr.bf16.mxu1 %v2550_v0  ;;  %p2453_p13 = scmp.ne.s32.totalorder %s3079_s11, %s2452_s24 }
  0x9a   : > { %2131 = vmatprep.subr.mxu0 %v2552_v1  ;;  %s3173_s18 = smov %s3172_s28 }
  0x9b   : > { %2097 = vmatmul.mubr.msk.f32.vlgmr.msra.gmra.mrb[0].mxu1 %vm521_vm1, %v2887_v14  ;;  %p2454_p6 = pnand %p2453_p13, %p2779_p10 }
  0x9c   : > { %2119 = vmatmul.mubr.msk.f32.vlgmr.msra.gmra.mrb[0].mxu0 %vm521_vm1, %v2887_v14  ;;  %2107 = vmatprep.mubr.msk.f32.mxu1 %vm2551_vm0, %v2552_v1 }
  0x9d   : > { %2133 = vmatprep.mubr.msk.f32.mxu0 %vm2551_vm0, %v2552_v1  ;;  %2190 = vmatpush3.bf16.msra.mxu1 %v2189_v18  ;;  %p2455_p3 = pneg %p2454_p6 }
  0x9e   : > { %2191 = vmatprep.subr.bf16.mxu1 %v2550_v0 }
  0xa1   : > { %2193 = vmatpush3.bf16.msra.mxu1 %v2192_v20 }
  0xa2   : > { %2121 = vmatprep.subr.mxu1 %v2552_v1 }
  0xa4   : > { %2108 = vmatmul.mubr.msk.f32.vlgmr.msra.gmra.mrb[2].mxu1 %vm521_vm1, %v2887_v14 }
  0xa5   : > { %2123 = vmatprep.mubr.msk.f32.mxu1 %vm2551_vm0, %v2552_v1 }
 0x16e   : > { %v591_v21 = vpop.f32.mrb[0].mxu1 }
 0x16f   : > { %670 = vrot.lane.b32.xlu0 %v591_v21, %s2553_s6  ;;  %v2098_v22 = vpop.f32.mrb[1].mxu1  ;;  %v991_v23 = vpop.f32.mrb[0].mxu0  ;;  %v673_v37 = vcombine.high %v591_v21, %v2552_v1  ;;  %v680_v39 = vrot.slane %v591_v21, %v2920_v35 }
 0x170   : > { %v995_v24 = vmul.f32 0.25, %v991_v23  ;;  %v2120_v25 = vpop.f32.mrb[1].mxu0 }
 0x171   : > { %v687_v43 = vrot.slane %v673_v37, %v2920_v35 }
 0x172   : > { %v1000_v47 = vcombine.high %v995_v24, %v2552_v1  ;;  %v1007_v53 = vrot.slane %v995_v24, %v2920_v35 }
 0x173   : > { %997 = vrot.lane.b32.xlu0 %v995_v24, %s2553_s6 }
 0x174   : > { %v1014_v60 = vrot.slane %v1000_v47, %v2920_v35 }
 0x177   : > { %v2917_v26 = vpop.f32.mrb[2].mxu1 }
 0x178   : > { %793 = vrot.lane.b32.xlu0 %v2917_v26, %s2553_s6  ;;  %v2109_v27 = vpop.f32.mrb[3].mxu1  ;;  %s3177_s6 = sld [smem:[#allocation18_spill]] }
 0x17e   : > { %s2043_s17 = sshll.u32 %s3177_s6, 7  ;;  %s2456_s6 = sshll.u32 %s2557_s13, 4  ;;  %s2457_s6 = int_to_ptr.vmem [resolvable:$false] %s2456_s6 }
 0x17f   : > { %p2459_p5 = scmp.lt.s32.totalorder %s3079_s11, %s2457_s6 }
 0x1e1   : > { %v671_v38 = vpop.permute.xlu0 %670 }
 0x1e2   : > { %v688_v41 = vcombine.high %v671_v38, %v2552_v1  ;;  %v695_v42 = vrot.slane %v671_v38, %v2920_v35 }
 0x1e4   : > { %v702_v44 = vrot.slane %v688_v41, %v2920_v35  ;;  %v703_v45 = vcombine.low %v680_v39, %v695_v42  ;;  %v704_v46 = vcombine.high %v680_v39, %v695_v42  ;;  %v796_v39 = vcombine.high %v2917_v26, %v2552_v1 }
 0x1e5   : > { %v998_v48 = vpop.permute.xlu0 %997  ;;  %v803_v41 = vrot.slane %v2917_v26, %v2920_v35 }
 0x1e6   : > { %v711_v49 = vrot.slane %v703_v45, %v2924_v40  ;;  %v718_v50 = vrot.slane %v704_v46, %v2924_v40  ;;  %v719_v51 = vcombine.low %v687_v43, %v702_v44  ;;  %v720_v52 = vcombine.high %v687_v43, %v702_v44 }
 0x1e7   : > { %v1015_v54 = vcombine.high %v998_v48, %v2552_v1  ;;  %v1022_v55 = vrot.slane %v998_v48, %v2920_v35  ;;  %v810_v43 = vrot.slane %v796_v39, %v2920_v35 }
 0x1e8   : > { %v727_v56 = vrot.slane %v719_v51, %v2924_v40  ;;  %v734_v57 = vrot.slane %v720_v52, %v2924_v40  ;;  %v739_v58 = vcombine.low %v711_v49, %v718_v50  ;;  %v2018_v59 = vcombine.high %v711_v49, %v718_v50 }
 0x1e9   : > { %v1029_v61 = vrot.slane %v1015_v54, %v2920_v35  ;;  %v1030_v62 = vcombine.low %v1007_v53, %v1022_v55  ;;  %v1031_v63 = vcombine.high %v1007_v53, %v1022_v55 }
 0x1ea   : > { %v746_v2 = vrot.slane %v739_v58, %v2920_v35  ;;  %v754_v3 = vrot.slane %v2018_v59, %v2920_v35  ;;  %v755_v4 = vcombine.low %v727_v56, %v734_v57  ;;  %v2019_v5 = vcombine.high %v727_v56, %v734_v57  ;;  %v794_v42 = vpop.permute.xlu0 %793 }
 0x1eb   : > { %v1038_v6 = vrot.slane %v1030_v62, %v2924_v40  ;;  %v1045_v7 = vrot.slane %v1031_v63, %v2924_v40  ;;  %v1046_v8 = vcombine.low %v1014_v60, %v1029_v61  ;;  %v1047_v9 = vcombine.high %v1014_v60, %v1029_v61 }
 0x1ec   : > { %v762_v10 = vrot.slane %v755_v4, %v2920_v35  ;;  %v770_v11 = vrot.slane %v2019_v5, %v2920_v35  ;;  %v771_v12 = vcombine.low %v746_v2, %v754_v3  ;;  %v811_v44 = vcombine.high %v794_v42, %v2552_v1 }
 0x1ed   : > { %v1054_v13 = vrot.slane %v1046_v8, %v2924_v40  ;;  %v1061_v15 = vrot.slane %v1047_v9, %v2924_v40  ;;  %v1066_v17 = vcombine.low %v1038_v6, %v1045_v7  ;;  %v2023_v18 = vcombine.high %v1038_v6, %v1045_v7 }
 0x1ee   : > { %v779_v16 = vcombine.low %v762_v10, %v770_v11  ;;  %v778_v21 = vrot.slane %v771_v12, %v2924_v40  ;;  %v818_v45 = vrot.slane %v794_v42, %v2920_v35  ;;  %v825_v46 = vrot.slane %v811_v44, %v2920_v35 }
 0x1ef   : > { %v1082_v19 = vcombine.low %v1054_v13, %v1061_v15  ;;  %v2024_v20 = vcombine.high %v1054_v13, %v1061_v15  ;;  %v1073_v28 = vrot.slane %v1066_v17, %v2920_v35  ;;  %v1081_v29 = vrot.slane %v2023_v18, %v2920_v35 }
 0x1f0   : > { %v786_v22 = vrot.slane %v779_v16, %v2924_v40  ;;  %v826_v47 = vcombine.low %v803_v41, %v818_v45  ;;  %v827_v48 = vcombine.high %v803_v41, %v818_v45  ;;  %v842_v51 = vcombine.low %v810_v43, %v825_v46 }
 0x1f1   : > { %v1089_v23 = vrot.slane %v1082_v19, %v2920_v35  ;;  %v1097_v24 = vrot.slane %v2024_v20, %v2920_v35  ;;  %v1098_v31 = vcombine.low %v1073_v28, %v1081_v29  ;;  %v843_v52 = vcombine.high %v810_v43, %v825_v46  ;;  %v1565_v28 = vld [vmem:[#allocation7 + $0x10] sm:$0xff] }
 0x1f2   : > { %v787_v25 = vcombine.low %v778_v21, %v786_v22  ;;  %v788_v27 = vcombine.high %v778_v21, %v786_v22  ;;  %v834_v49 = vrot.slane %v826_v47, %v2924_v40  ;;  %v841_v50 = vrot.slane %v827_v48, %v2924_v40 }
 0x1f3   : > { %v1106_v30 = vcombine.low %v1089_v23, %v1097_v24  ;;  %v1105_v33 = vrot.slane %v1098_v31, %v2924_v40  ;;  %v850_v53 = vrot.slane %v842_v51, %v2924_v40  ;;  %v857_v26 = vrot.slane %v843_v52, %v2924_v40 }
 0x1f4   : > { %790 = vst.msk [vmem:[#allocation2] sm:$0xff] %vm789_vm2, %v787_v25  ;;  %791 = vst.msk [vmem:[#allocation2 + $0x8] sm:$0xff] %vm789_vm2, %v788_v27  ;;  %v862_v54 = vcombine.low %v834_v49, %v841_v50  ;;  %v2020_v55 = vcombine.high %v834_v49, %v841_v50  ;;  %v1563_v25 = vld [vmem:[#allocation7] sm:$0xff]  ;;  %v1564_v27 = vld [vmem:[#allocation7 + $0x8] sm:$0xff] }
 0x1f5   : > { %v1113_v32 = vrot.slane %v1106_v30, %v2924_v40  ;;  %v878_v58 = vcombine.low %v850_v53, %v857_v26  ;;  %v2021_v59 = vcombine.high %v850_v53, %v857_v26  ;;  %v2201_v29 = vpack.c.bf16 %v1564_v27, %v1563_v25  ;;  %v1566_v30 = vld [vmem:[#allocation7 + $0x18] sm:$0xff]  ;;  %v1758_v25 = vld [vmem:[%s3173_s18 + $0x10] sm:$0xff] }
 0x1f6   : > { %v869_v56 = vrot.slane %v862_v54, %v2920_v35  ;;  %v877_v57 = vrot.slane %v2020_v55, %v2920_v35  ;;  %v2204_v31 = vpack.c.bf16 %v1566_v30, %v1565_v28  ;;  %v1759_v28 = vld [vmem:[%s3173_s18 + $0x18] sm:$0xff]  ;;  %v1760_v30 = vld [vmem:[%s3173_s18 + $0x20] sm:$0xff] }
 0x1f7   : > { %v1114_v36 = vcombine.low %v1105_v33, %v1113_v32  ;;  %v1115_v38 = vcombine.high %v1105_v33, %v1113_v32  ;;  %v885_v60 = vrot.slane %v878_v58, %v2920_v35  ;;  %v893_v61 = vrot.slane %v2021_v59, %v2920_v35 }
 0x1f8   : > { %v894_v62 = vcombine.low %v869_v56, %v877_v57 }
 0x1f9   : > { %v902_v2 = vcombine.low %v885_v60, %v893_v61 }
 0x1fa   : > { %v901_v63 = vrot.slane %v894_v62, %v2924_v40 }
 0x1fb   : > { %v1116_v34 = vld [vmem:[#allocation2] sm:$0xff]  ;;  %v1117_v37 = vld [vmem:[#allocation2 + $0x8] sm:$0xff]  ;;  %v909_v3 = vrot.slane %v902_v2, %v2924_v40 }
 0x1fc   : > { %2122 = vmatpush3.xpose.msk.msra.mxu1 %vm789_vm2, %v1116_v34 }
 0x1fd   : > { %2126 = vmatprep.subr.mxu1 %v2552_v1  ;;  %v910_v4 = vcombine.low %v901_v63, %v909_v3  ;;  %v911_v5 = vcombine.high %v901_v63, %v909_v3 }
 0x1ff   : > { %2124 = vmatmul.mubr.msk.f32.vlgmr.msra.gmra.mrb[4].mxu1 %vm789_vm2, %v1114_v36  ;;  %912 = vst.msk [vmem:[#allocation3] sm:$0xff] %vm789_vm2, %v910_v4  ;;  %913 = vst.msk [vmem:[#allocation3 + $0x8] sm:$0xff] %vm789_vm2, %v911_v5 }
 0x200   : > { %2127 = vmatpush3.xpose.msk.msra.mxu1 %vm789_vm2, %v1117_v37  ;;  %2128 = vmatprep.mubr.msk.f32.mxu1 %vm2551_vm0, %v2552_v1 }
 0x201   : > { %2136 = vmatprep.subr.mxu1 %v2552_v1 }
 0x203   : > { %2129 = vmatmul.mubr.msk.f32.vlgmr.msra.gmra.mrb[6].mxu1 %vm789_vm2, %v1115_v38 }
 0x204   : > { %2138 = vmatprep.mubr.msk.f32.mxu1 %vm2551_vm0, %v2552_v1 }
 0x206   : > { %v1290_v6 = vld [vmem:[#allocation3] sm:$0xff]  ;;  %v1291_v7 = vld [vmem:[#allocation3 + $0x8] sm:$0xff] }
 0x207   : > { %2132 = vmatpush3.msra.mxu0 %v1290_v6  ;;  %2137 = vmatpush3.msra.mxu1 %v1291_v7 }
 0x208   : > { %2200 = vmatprep.subr.bf16.mxu0 %v2550_v0  ;;  %2206 = vmatprep.subr.bf16.mxu1 %v2550_v0 }
 0x2d2   : > { %v1191_v8 = vpop.f32.mrb[4].mxu1 }
 0x2d3   : > { %v2125_v9 = vpop.f32.mrb[5].mxu1  ;;  %v1272_v10 = vsel %vm1271_vm3, %v1191_v8, -inf }
 0x2d4   : > { %1273 = vmax.xlane.f32.xlu1 %v1272_v10 }
 0x2d6   : > { %v1267_v11 = vpop.f32.mrb[6].mxu1 }
 0x2d7   : > { %v2130_v12 = vpop.f32.mrb[7].mxu1  ;;  %v1275_v13 = vsel %vm1271_vm3, %v1267_v11, -inf }
 0x2d8   : > { %1276 = vmax.xlane.f32.xlu1 %v1275_v13 }
 0x361   : > { %v1274_v15 = vpop.xlane.xlu1 %1273 }
 0x362   : > { %v1278_v16 = vsub.f32 %v1191_v8, %v1274_v15 }
 0x364   : > { %v1280_v17 = vmul.f32 1.442695, %v1278_v16 }
 0x365   : > { %v1277_v18 = vpop.xlane.xlu1 %1276 }
 0x366   : > { %2326 = vpow2.f32 %v1280_v17  ;;  %v1279_v19 = vsub.f32 %v1267_v11, %v1277_v18 }
 0x368   : > { %v1282_v20 = vmul.f32 1.442695, %v1279_v19  ;;  %v1671_v19 = vld [vmem:[#allocation9] sm:$0xff] }
 0x36a   : > { %2328 = vpow2.f32 %v1282_v20  ;;  %v1672_v20 = vld [vmem:[#allocation9 + $0x8] sm:$0xff] }
 0x370   : > { %v2327_v21 = vpop.eup %2326 }
 0x371   : > { %2134 = vmatmul.mubr.msk.f32.vlgmr.msra.gmra.mrb[2].mxu0 %vm1271_vm3, %v2327_v21  ;;  %v1284_v22 = vsel %vm1271_vm3, %v2327_v21, 0.0  ;;  %v2207_v21 = vpack.c.bf16 %v1672_v20, %v1671_v19 }
 0x372   : > { %1285 = vadd.xlane.f32.xlu1 %v1284_v22  ;;  %2149 = vmatprep.mubr.msk.f32.mxu0 %vm2551_vm0, %v2552_v1  ;;  %v1673_v22 = vld [vmem:[#allocation9 + $0x10] sm:$0xff] }
 0x373   : > { %2202 = vmatpush3.bf16.msra.mxu0 %v2201_v29  ;;  %v2216_v29 = vpack.c.bf16 %v1759_v28, %v1758_v25 }
 0x374   : > { %v2329_v23 = vpop.eup %2328  ;;  %2203 = vmatprep.subr.bf16.mxu0 %v2550_v0 }
 0x375   : > { %2139 = vmatmul.mubr.msk.f32.vlgmr.msra.gmra.mrb[8].mxu1 %vm1271_vm3, %v2329_v23  ;;  %v1287_v24 = vsel %vm1271_vm3, %v2329_v23, 0.0  ;;  %v1756_v23 = vld [vmem:[%s3172_s28] sm:$0xff] }
 0x376   : > { %1288 = vadd.xlane.f32.xlu0 %v1287_v24  ;;  %2160 = vmatprep.mubr.msk.f32.mxu1 %vm2551_vm0, %v2552_v1  ;;  %v1757_v24 = vld [vmem:[%s3173_s18 + $0x8] sm:$0xff] }
 0x377   : > { %2205 = vmatpush3.bf16.msra.mxu0 %v2204_v31  ;;  %2208 = vmatpush3.bf16.msra.mxu1 %v2207_v21  ;;  %v2213_v27 = vpack.c.bf16 %v1757_v24, %v1756_v23  ;;  %v1761_v31 = vld [vmem:[%s3173_s18 + $0x28] sm:$0xff] }
 0x378   : > { %2212 = vmatprep.subr.bf16.mxu0 %v2550_v0  ;;  %2209 = vmatprep.subr.bf16.mxu1 %v2550_v0 }
 0x3ff   : > { %v1286_v32 = vpop.xlane.xlu1 %1285 }
 0x400   : > { %2330 = vrcp.f32 %v1286_v32  ;;  %v2219_v32 = vpack.c.bf16 %v1761_v31, %v1760_v30 }
 0x403   : > { %v1289_v33 = vpop.xlane.xlu0 %1288 }
 0x404   : > { %2332 = vrcp.f32 %v1289_v33 }
 0x40a   : > { %v2331_v34 = vpop.eup %2330 }
 0x40e   : > { %v2333_v39 = vpop.eup %2332 }
 0x444   : > { %v1361_v36 = vpop.f32.mrb[2].mxu0 }
 0x445   : > { %v1440_v37 = vmul.f32 %v2331_v34, %v1361_v36  ;;  %v2135_v38 = vpop.f32.mrb[3].mxu0 }
 0x446   : > { %v2034_v38 = vld [vmem:[%s3174_s15] ss:$0 sm:$0xff]  ;;  %s3178_s15 = sld [smem:[#allocation24_spill]] }
 0x447   : > { %v1442_v42 = vcombine.high %v1440_v37, %v2552_v1  ;;  %v1449_v45 = vrot.slane %v1440_v37, %v2920_v35 }
 0x448   : > { %v1434_v41 = vpop.f32.mrb[8].mxu1 }
 0x449   : > { %v1441_v43 = vmul.f32 %v2333_v39, %v1434_v41  ;;  %v2140_v44 = vpop.f32.mrb[9].mxu1  ;;  %v1456_v48 = vrot.slane %v1442_v42, %v2920_v35  ;;  %v2035_v41 = vld [vmem:[%s3175_s9] ss:$0 sm:$0xff]  ;;  %s3179_s9 = sld [smem:[#allocation25_spill]] }
 0x44a   : > { %v1763_v44 = vld [vmem:[%s3173_s18 + $0x38] sm:$0xff] }
 0x44b   : > { %v1457_v46 = vcombine.high %v1441_v43, %v2552_v1  ;;  %v1464_v47 = vrot.slane %v1441_v43, %v2920_v35 }
 0x44d   : > { %v1471_v49 = vrot.slane %v1457_v46, %v2920_v35  ;;  %v1472_v50 = vcombine.low %v1449_v45, %v1464_v47  ;;  %v1473_v51 = vcombine.high %v1449_v45, %v1464_v47  ;;  %v2036_v46 = vld [vmem:[#allocation10] ss:$0 sm:$0xff] }
 0x44f   : > { %v1480_v52 = vrot.slane %v1472_v50, %v2924_v40  ;;  %v1487_v53 = vrot.slane %v1473_v51, %v2924_v40  ;;  %v1488_v26 = vcombine.low %v1456_v48, %v1471_v49  ;;  %v1489_v54 = vcombine.high %v1456_v48, %v1471_v49  ;;  %v2038_v51 = vld [vmem:[%s3176_s10] ss:$0 sm:$0xff]  ;;  %s3077_s10 = scalar_lea.hbm %s3180_s19, %s2043_s17 }
 0x451   : > { %v1496_v55 = vrot.slane %v1488_v26, %v2924_v40  ;;  %v1503_v56 = vrot.slane %v1489_v54, %v2924_v40  ;;  %v1508_v57 = vcombine.low %v1480_v52, %v1487_v53  ;;  %v2031_v58 = vcombine.high %v1480_v52, %v1487_v53 }
 0x453   : > { %v1524_v59 = vcombine.low %v1496_v55, %v1503_v56  ;;  %v2032_v60 = vcombine.high %v1496_v55, %v1503_v56  ;;  %v1515_v61 = vrot.slane %v1508_v57, %v2920_v35  ;;  %v1523_v62 = vrot.slane %v2031_v58, %v2920_v35 }
 0x455   : > { %v1531_v63 = vrot.slane %v1524_v59, %v2920_v35  ;;  %v1539_v2 = vrot.slane %v2032_v60, %v2920_v35  ;;  %v1540_v3 = vcombine.low %v1515_v61, %v1523_v62 }
 0x457   : > { %v1548_v4 = vcombine.low %v1531_v63, %v1539_v2  ;;  %v1547_v5 = vrot.slane %v1540_v3, %v2924_v40  ;;  %v2040_v3 = vld [vmem:[%s3178_s15] ss:$0 sm:$0xff]  ;;  %s2458_s15 = scalar_lea.vmem %s2457_s6, 256 }
 0x458   : > { %p2460_p7 = scmp.lt.s32.totalorder %s2458_s15, %s2452_s24 }
 0x459   : > { %v1555_v6 = vrot.slane %v1548_v4, %v2924_v40 }
 0x45a   : > { %p2461_p9 = por %p2460_p7, %p2459_p5 }
 0x45b   : > { %v1557_v7 = vcombine.high %v1547_v5, %v1555_v6  ;;  %v1556_v8 = vcombine.low %v1547_v5, %v1555_v6  ;;  %v2041_v5 = vld [vmem:[%s3179_s9] ss:$0 sm:$0xff] }
 0x45c   : > { %p2462_p0 = pnand %p2461_p9, %p2455_p3 }
 0x45d   : > { %1559 = vrot.lane.b32.xlu1 %v1557_v7, %s2556_s21  ;;  %s1877_s21 = scalar_lea.sflag [#allocation6], %s2834_s12 }
 0x4cf   : > { %v1560_v9 = vpop.permute.xlu1 %1559 }
 0x4d0   : > { %v1562_v10 = vsel %vm789_vm2, %v1556_v8, %v1560_v9 }
 0x4d1   : > { %2150 = vmatmul.mubr.msk.f32.vlgmr.msra.gmra.mrb[4].mxu0 %vm521_vm1, %v1562_v10 }
 0x4d2   : > { %2179 = vmatprep.mubr.msk.f32.mxu0 %vm2551_vm0, %v2552_v1  ;;  %v1674_v1 = vld [vmem:[#allocation9 + $0x18] sm:$0xff]  ;;  %2214 = vmatpush3.bf16.msra.mxu0 %v2213_v27 }
 0x4d3   : > { %2215 = vmatprep.subr.bf16.mxu0 %v2550_v0 }
 0x4d6   : > { %2217 = vmatpush3.bf16.msra.mxu0 %v2216_v29 }
 0x4d7   : > { %2218 = vmatprep.subr.bf16.mxu0 %v2550_v0 }
 0x4da   : > { %2220 = vmatpush3.bf16.msra.mxu0 %v2219_v32 }
 0x4db   : > { %2221 = vmatprep.subr.bf16.mxu0 %v2550_v0  ;;  %v1762_v0 = vld [vmem:[%s3173_s18 + $0x30] sm:$0xff] }
 0x4dc   : > { %v2222_v45 = vpack.c.bf16 %v1763_v44, %v1762_v0 }
 0x4de   : > { %2223 = vmatpush3.bf16.msra.mxu0 %v2222_v45 }
 0x5a4   : > { %v1636_v11 = vpop.f32.mrb[4].mxu0 }
 0x5a5   : > { %v1640_v35 = vadd.f32 %v1636_v11, %v2887_v14  ;;  %v2151_v12 = vpop.f32.mrb[5].mxu0  ;;  %v2210_v14 = vpack.c.bf16 %v1674_v1, %v1673_v22 }
 0x5a7   : > { %v1643_v13 = vsel %vm521_vm1, %v1640_v35, 0.0  ;;  %2211 = vmatpush3.bf16.msra.mxu1 %v2210_v14 }
 0x5a8   : > { %1644 = vadd.xlane.f32.xlu1 %v1643_v13 }
 0x635   : > { %v1645_v40 = vpop.xlane.xlu1 %1644 }
 0x636   : > { %v1647_v15 = vmul.f32 0.03125, %v1645_v40 }
 0x638   : > { %v1648_v16 = vsub.f32 %v1640_v35, %v1647_v15 }
 0x63a   : > { %v1649_v17 = vmul.f32 %v1648_v16, %v1648_v16 }
 0x63c   : > { %v1650_v18 = vsel %vm521_vm1, %v1649_v17, 0.0 }
 0x63d   : > { %1651 = vadd.xlane.f32.xlu0 %v1650_v18 }
 0x6ca   : > { %v1652_v33 = vpop.xlane.xlu0 %1651 }
 0x6cb   : > { %v1653_v34 = vmul.f32 0.03125, %v1652_v33 }
 0x6cd   : > { %v1654_v36 = vadd.f32 1e-05, %v1653_v34 }
 0x6cf   : > { %2334 = vrsqrt.f32 %v1654_v36 }
 0x6d9   : > { %v2335_v37 = vpop.eup %2334 }
 0x6da   : > { %v1656_v39 = vmul.f32 %v2335_v37, %v1648_v16 }
 0x6dc   : > { %v1663_v42 = vmul.f32 %v2034_v38, %v1656_v39 }
 0x6de   : > { %v1670_v43 = vadd.f32 %v2035_v41, %v1663_v42 }
 0x6e0   : > { %2161 = vmatmul.mubr.msk.f32.vlgmr.msra.gmra.mrb[10].mxu1 %vm521_vm1, %v1670_v43 }
 0x7b3   : > { %v1751_v47 = vpop.f32.mrb[10].mxu1 }
 0x7b4   : > { %v1752_v48 = vadd.f32 %v2036_v46, %v1751_v47  ;;  %v2162_v49 = vpop.f32.mrb[11].mxu1 }
 0x7b6   : > { %v1755_v50 = vmax.f32 %v1752_v48, 0.0 }
 0x7b8   : > { %2180 = vmatmul.mubr.msk.f32.vlgmr.msra.gmra.mrb[6].mxu0 %vm1771_vm4, %v1755_v50 }
 0x88b   : > { %v1841_v52 = vpop.f32.mrb[6].mxu0 }
 0x88c   : > { %v1842_v53 = vadd.f32 %v2038_v51, %v1841_v52  ;;  %v2181_v26 = vpop.f32.mrb[7].mxu0 }
 0x88e   : > { %v1845_v54 = vadd.f32 %v1842_v53, %v1670_v43 }
 0x890   : > { %v1848_v55 = vsel %vm521_vm1, %v1845_v54, 0.0 }
 0x891   : > { %1849 = vadd.xlane.f32.xlu0 %v1848_v55 }
 0x91e   : > { %v1850_v56 = vpop.xlane.xlu0 %1849 }
 0x91f   : > { %v1851_v57 = vmul.f32 0.03125, %v1850_v56 }
 0x921   : > { %v1852_v58 = vsub.f32 %v1845_v54, %v1851_v57 }
 0x923   : > { %v1853_v59 = vmul.f32 %v1852_v58, %v1852_v58 }
 0x925   : > { %v1854_v60 = vsel %vm521_vm1, %v1853_v59, 0.0 }
 0x926   : > { %1855 = vadd.xlane.f32.xlu0 %v1854_v60 }
 0x9b3   : > { %v1856_v61 = vpop.xlane.xlu0 %1855 }
 0x9b4   : > { %v1857_v62 = vmul.f32 0.03125, %v1856_v61 }
 0x9b6   : > { %v1858_v63 = vadd.f32 1e-05, %v1857_v62 }
 0x9b8   : > { %2336 = vrsqrt.f32 %v1858_v63 }
 0x9c2   : > { %v2337_v2 = vpop.eup %2336 }
 0x9c3   : > { %v1860_v4 = vmul.f32 %v2337_v2, %v1852_v58 }
 0x9c5   : > { %v1867_v6 = vmul.f32 %v2040_v3, %v1860_v4 }
 0x9c7   : > { %v1874_v7 = vadd.f32 %v2041_v5, %v1867_v6 }
 0x9c9   : > { %1875 = vst.msk [vmem:[%s511_s16] sm:$0xff] %vm521_vm1, %v1874_v7 }
 0x9ca   : > { %2465 = shalt.err (!%p2462_p0)
}
 0x9cb   : > { %s2466_s12 = scalar_lea.hbm %s3077_s10, 128  ;;  %s2470_s9 = scalar_lea.hbm %s3180_s19, 256 }
 0x9cc   : > { %p2467_p4 = scmp.ne.s32.totalorder %s3077_s10, %s2466_s12  ;;  %p2471_p1 = scmp.lt.u32.totalorder %s3077_s10, %s3180_s19 }
 0x9cd   : > { %p2472_p12 = scmp.lt.u32.totalorder %s2470_s9, %s2466_s12  ;;  %p2474_p13 = scmp.lt.u32.totalorder %s2466_s12, %s3077_s10 }
 0x9ce   : > { %p2468_p2 = pnand %p2467_p4, %p2779_p10 }
 0x9cf   : > { %p2473_p11 = por %p2472_p12, %p2471_p1 }
 0x9d0   : > { %p2469_p8 = pneg %p2468_p2 }
 0x9d1   : > { %p2475_p6 = por %p2474_p13, %p2473_p11 }
 0x9d3   : > { %p2476_p3 = pnand %p2475_p6, %p2469_p8 }
 0x9d5   : > { %2479 = shalt.err (!%p2476_p3)
}
 0x9d6   : > { %2238 = dma.vmem_to_hbm [thread:$0]  (%p2779_p10), %s3079_s11, 128, %s3077_s10, %s1877_s21  }
 0x9d7 PF: > { %s3181_s22 = sld [smem:[#allocation17_spill]]  ;;  %s3182_s14 = sld [smem:[#allocation19_spill]] }
 0x9d8   : > { %p3184_p7 = scmp.ge.s32.totalorder %s2542_s30, 2 }
 0x9dd   : > { %s1903_s24 = sand.u32 1, %s3181_s22   ;;  %p3183_p5 = scmp.ne.s32.totalorder %s3182_s14, 0 }
 0x9de   : > { %s1904_s13 = scalar_lea.sflag [#allocation6], %s1903_s24 }
 0x9df   : > { %p2255_p9 = pnand %p3184_p7, %p3183_p5 }
 0x9e1   : > { %2517 = dma.done.wait (!%p2255_p9), %s1904_s13, 128  }
 0x9e2   : > { %2519 = vsyncadd (!%p2255_p9), %s1904_s13, 4294967168  ;;  %s31_s30 = sadd.s32 1, %s2542_s30   ;;  %s3185_s23 = smov %s2791_s25 }
 0x9e3   : > { %p28_p0 = scmp.ge.s32.totalorder %s31_s30, 4   ;;  %s3186_s25 = smov %s2526_s26 }
 0x9e4   : > { %s3187_s26 = smov %s2530_s27  ;;  %s3188_s27 = smov %s3185_s23 }
 0x9e5   : > { %s3189_s28 = smov %s2538_s29  ;;  %s3190_s29 = smov %s3192_s5 }
 0x9e6   :  { %30 = sbr.rel (!%p28_p0) target bundleno = 16 (0x10), region = 134 }
 0x9ed   :  { %1909 = vsyncpa [#allocation5], 1 }
 0x9ee   :  { %1911 = vsyncpa [#allocation5 + $0x1], 1 }
 0x9ef   :  { %1912 = vsyncpa [#allocation8], 1 }
 0x9f0   :  { %1913 = vsyncpa [#allocation11], 1 }
 0x9f1   :  { %1914 = vsyncpa [#allocation6], 1 }
 0x9f2   :  { %1916 = vsyncpa [#allocation6 + $0x1], 1 }

</bundles_post_ra>
